<compile_context>
chip_gen: v6e
topology: v6e:2x2x1
jax: 0.10.0
libtpu: 0.0.40
codegen_flags: <defaults>
</compile_context>

<pallas_src>
import functools

import jax
import jax.numpy as jnp
from jax.experimental import pallas as pl
from jax.experimental.pallas import tpu as pltpu

EPS = 1e-5  # nn.InstanceNorm2d default


# --------------------------- fused Pallas kernel -----------------------------
def _norm_prelu_conv_kernel(x_ref, mask_ref, alpha_ref, w_ref, b_ref, o_ref,
                            *, H, W, Wp, K, HWp):
    """One batch element per grid step.

    x_ref     : (1, C, Lp)  f32   zero-padded, flattened activations (Lp=(Hp+1)*Wp)
    mask_ref  : (1, Lp)     f32   1.0 on the un-padded interior, 0.0 on the pad ring
    alpha_ref : (C, 1)      f32   PReLU per-channel slope
    w_ref     : (K*K, Cout, C) bf16   conv weight, one (Cout, C) matrix per tap
    b_ref     : (Cout, 1)   f32   conv bias
    o_ref     : (1, Cout, HWp) f32  conv output in padded-row-stride flat coords
    """
    x = x_ref[0]                                        # (C, Lp) f32

    # ---- InstanceNorm2d (single pass; zero padding contributes 0 to both sums) ----
    inv_n = jnp.float32(1.0 / (H * W))
    s = jnp.sum(x, axis=1, keepdims=True)               # (C, 1)   lane-dense reduce
    ss = jnp.sum(x * x, axis=1, keepdims=True)          # (C, 1)
    mu = s * inv_n
    var = ss * inv_n - mu * mu                          # population variance
    rstd = jax.lax.rsqrt(var + EPS)                     # EUP
    xn = (x - mu) * rstd

    # ---- PReLU (per-channel alpha), then re-zero the padding ring ----
    a = alpha_ref[...]                                  # (C, 1)
    y = jnp.where(xn >= 0.0, xn, a * xn)
    y = y * mask_ref[...]                               # (1, Lp) broadcast
    y_bf = y.astype(jnp.bfloat16)                       # bf16 operands for the MXU

    # ---- Conv2d as K*K accumulated shifted matmuls (no im2col materialization) ----
    cout = o_ref.shape[1]
    acc = jnp.zeros((cout, HWp), jnp.float32)
    for kh in range(K):
        for kw in range(K):
            off = kh * Wp + kw
            slab = y_bf[:, off:off + HWp]               # (C, HWp) lane slice
            acc = acc + jnp.dot(w_ref[kh * K + kw], slab,
                                preferred_element_type=jnp.float32)

    o_ref[0] = acc + b_ref[...]                         # lane-dense (Cout, HWp) store


# ------------------------------- forward pass --------------------------------
def thin_unet_up_block(bot, hor, params):
    # TrivialUpsample: nearest neighbour, scale_factor=2
    bot_big = jnp.repeat(jnp.repeat(bot, 2, axis=2), 2, axis=3)
    N, _, H, W = bot_big.shape

    # cut_to_match(bot_big, hor, n_pref=2): centered spatial crop of hor
    Hh, Wh = hor.shape[2], hor.shape[3]
    dy, dx = (Hh - H) // 2, (Wh - W) // 2
    hor_c = hor[:, :, dy:dy + H, dx:dx + W]

    combined = jnp.concatenate([bot_big, hor_c], axis=1)        # (N, C, H, W)
    C = combined.shape[1]

    weight = params["weight"].astype(jnp.float32)
    bias = params["bias"].astype(jnp.float32)
    alpha = params["alpha"].astype(jnp.float32)
    Cout, _, K, _ = weight.shape
    p = K // 2
    Hp, Wp = H + 2 * p, W + 2 * p
    HWp = H * Wp                                                 # flat output width
    Lp = (Hp + 1) * Wp      # +1 zero row keeps every shifted slab in bounds

    # Zero-pad spatially (≈1.3x data movement, not 25x im2col) and flatten H,W.
    xpad = jnp.pad(combined, ((0, 0), (0, 0), (p, p + 1), (p, p)))
    x_flat = xpad.reshape(N, C, Lp)

    # Interior mask in padded-flat coordinates (pad ring must be zero after norm+PReLU).
    rr = jnp.arange(Hp + 1)
    cc = jnp.arange(Wp)
    m2 = ((rr[:, None] >= p) & (rr[:, None] < p + H)
          & (cc[None, :] >= p) & (cc[None, :] < p + W))
    mask = m2.astype(jnp.float32).reshape(1, Lp)

    # Weight as one (Cout, C) matrix per conv tap, bf16 for the MXU.
    w_taps = weight.transpose(2, 3, 0, 1).reshape(K * K, Cout, C).astype(jnp.bfloat16)
    alpha_c = alpha.reshape(C, 1)
    bias_c = bias.reshape(Cout, 1)

    kernel = functools.partial(_norm_prelu_conv_kernel,
                               H=H, W=W, Wp=Wp, K=K, HWp=HWp)

    out_flat = pl.pallas_call(
        kernel,
        out_shape=jax.ShapeDtypeStruct((N, Cout, HWp), jnp.float32),
        grid=(N,),
        in_specs=[
            pl.BlockSpec((1, C, Lp), lambda n: (n, 0, 0)),
            pl.BlockSpec((1, Lp), lambda n: (0, 0)),
            pl.BlockSpec((C, 1), lambda n: (0, 0)),
            pl.BlockSpec((K * K, Cout, C), lambda n: (0, 0, 0)),
            pl.BlockSpec((Cout, 1), lambda n: (0, 0)),
        ],
        out_specs=pl.BlockSpec((1, Cout, HWp), lambda n: (n, 0, 0)),
        compiler_params=pltpu.CompilerParams(dimension_semantics=("parallel",)),
    )(x_flat, mask, alpha_c, w_taps, bias_c)

    # Drop the junk columns introduced by the padded row stride (data movement only).
    out = out_flat.reshape(N, Cout, H, Wp)[:, :, :, :W]
    return out


# ------------------------------ pure-JAX reference ---------------------------
def reference(bot, hor, params):
    bot_big = jnp.repeat(jnp.repeat(bot, 2, axis=2), 2, axis=3)
    N, _, H, W = bot_big.shape
    Hh, Wh = hor.shape[2], hor.shape[3]
    dy, dx = (Hh - H) // 2, (Wh - W) // 2
    hor_c = hor[:, :, dy:dy + H, dx:dx + W]
    combined = jnp.concatenate([bot_big, hor_c], axis=1)

    mu = combined.mean(axis=(2, 3), keepdims=True)
    var = ((combined - mu) ** 2).mean(axis=(2, 3), keepdims=True)
    xn = (combined - mu) / jnp.sqrt(var + EPS)
    a = params["alpha"].reshape(1, -1, 1, 1)
    y = jnp.where(xn >= 0.0, xn, a * xn)

    K = params["weight"].shape[-1]
    p = K // 2
    out = jax.lax.conv_general_dilated(
        y, params["weight"], window_strides=(1, 1),
        padding=[(p, p), (p, p)],
        dimension_numbers=("NCHW", "OIHW", "NCHW"))
    return out + params["bias"].reshape(1, -1, 1, 1)


if __name__ == "__main__":
    key = jax.random.PRNGKey(0)
    k_bot, k_hor, k_w, k_b = jax.random.split(key, 4)

    bottom_, horizontal_, out_, size = 4, 4, 4, 5
    N, Hb, Wb = 2, 8, 8
    cat_ = bottom_ + horizontal_

    bot = jax.random.normal(k_bot, (N, bottom_, Hb, Wb), jnp.float32)
    # hor slightly larger so cut_to_match actually crops (18x18 -> 16x16)
    hor = jax.random.normal(k_hor, (N, horizontal_, 2 * Hb + 2, 2 * Wb + 2), jnp.float32)

    params = {
        "alpha": jnp.full((cat_,), 0.25, jnp.float32),                      # nn.PReLU default
        "weight": 0.1 * jax.random.normal(k_w, (out_, cat_, size, size), jnp.float32),
        "bias": 0.1 * jax.random.normal(k_b, (out_,), jnp.float32),
    }

    got = jax.block_until_ready(thin_unet_up_block(bot, hor, params))
    want = reference(bot, hor, params)

    assert got.shape == (N, out_, 2 * Hb, 2 * Wb), got.shape
    err = float(jnp.max(jnp.abs(got - want)))
    # MXU operands are bf16 (f32 accumulation, f32 reference) -> bf16-level tolerance.
    assert err < 5e-2, f"max abs error {err}"
    print("KERNEL_OK")
</pallas_src>

<mosaic_0001>
module attributes {stable_mosaic.version = 11 : i64} {
  func.func @_norm_prelu_conv_kernel(%arg0: i32, %arg1: memref<1x8x420xf32, #tpu.memory_space<vmem>>, %arg2: memref<1x420xf32, #tpu.memory_space<vmem>>, %arg3: memref<8x1xf32, #tpu.memory_space<vmem>>, %arg4: memref<25x4x8xbf16, #tpu.memory_space<vmem>>, %arg5: memref<4x1xf32, #tpu.memory_space<vmem>>, %arg6: memref<1x4x320xf32, #tpu.memory_space<vmem>>) attributes {dimension_semantics = [#tpu.dimension_semantics<parallel>], iteration_bounds = array<i64: 2>, scalar_prefetch = 0 : i64, scratch_operands = 0 : i64, tpu.core_type = #tpu.core_type<tc>, window_params = [{transform_indices = @transform_0, window_bounds = array<i64: 1, 8, 420>}, {pipeline_mode = #tpu.pipeline_mode<synchronous>, transform_indices = @transform_1, window_bounds = array<i64: 1, 420>}, {pipeline_mode = #tpu.pipeline_mode<synchronous>, transform_indices = @transform_2, window_bounds = array<i64: 8, 1>}, {pipeline_mode = #tpu.pipeline_mode<synchronous>, transform_indices = @transform_3, window_bounds = array<i64: 25, 4, 8>}, {pipeline_mode = #tpu.pipeline_mode<synchronous>, transform_indices = @transform_4, window_bounds = array<i64: 4, 1>}, {transform_indices = @transform_5, window_bounds = array<i64: 1, 4, 320>}]} {
    %c0 = arith.constant 0 : index
    %c0_0 = arith.constant 0 : index
    %c0_1 = arith.constant 0 : index
    %0 = vector.load %arg1[%c0, %c0_0, %c0_1] : memref<1x8x420xf32, #tpu.memory_space<vmem>>, vector<1x8x420xf32>
    %1 = vector.shape_cast %0 : vector<1x8x420xf32> to vector<8x420xf32>
    %cst = arith.constant dense<0.000000e+00> : vector<8xf32>
    %2 = vector.multi_reduction <add>, %1, %cst [1] : vector<8x420xf32> to vector<8xf32>
    %3 = vector.shape_cast %2 : vector<8xf32> to vector<8x1xf32>
    %4 = arith.mulf %1, %1 : vector<8x420xf32>
    %cst_2 = arith.constant dense<0.000000e+00> : vector<8xf32>
    %5 = vector.multi_reduction <add>, %4, %cst_2 [1] : vector<8x420xf32> to vector<8xf32>
    %6 = vector.shape_cast %5 : vector<8xf32> to vector<8x1xf32>
    %cst_3 = arith.constant 3.906250e-03 : f32
    %7 = vector.broadcast %cst_3 : f32 to vector<8x1xf32>
    %8 = arith.mulf %3, %7 : vector<8x1xf32>
    %cst_4 = arith.constant 3.906250e-03 : f32
    %9 = vector.broadcast %cst_4 : f32 to vector<8x1xf32>
    %10 = arith.mulf %6, %9 : vector<8x1xf32>
    %11 = arith.mulf %8, %8 : vector<8x1xf32>
    %12 = arith.subf %10, %11 : vector<8x1xf32>
    %cst_5 = arith.constant 9.99999974E-6 : f32
    %13 = vector.broadcast %cst_5 : f32 to vector<8x1xf32>
    %14 = arith.addf %12, %13 : vector<8x1xf32>
    %15 = math.rsqrt %14 : vector<8x1xf32>
    %16 = vector.broadcast %8 : vector<8x1xf32> to vector<8x420xf32>
    %17 = arith.subf %1, %16 : vector<8x420xf32>
    %18 = vector.broadcast %15 : vector<8x1xf32> to vector<8x420xf32>
    %19 = arith.mulf %17, %18 : vector<8x420xf32>
    %c0_6 = arith.constant 0 : index
    %c0_7 = arith.constant 0 : index
    %20 = vector.load %arg3[%c0_6, %c0_7] : memref<8x1xf32, #tpu.memory_space<vmem>>, vector<8x1xf32>
    %cst_8 = arith.constant 0.000000e+00 : f32
    %21 = vector.broadcast %cst_8 : f32 to vector<8x420xf32>
    %22 = arith.cmpf oge, %19, %21 : vector<8x420xf32>
    %23 = vector.broadcast %20 : vector<8x1xf32> to vector<8x420xf32>
    %24 = arith.mulf %23, %19 : vector<8x420xf32>
    %25 = arith.select %22, %19, %24 : vector<8x420xi1>, vector<8x420xf32>
    %c0_9 = arith.constant 0 : index
    %c0_10 = arith.constant 0 : index
    %26 = vector.load %arg2[%c0_9, %c0_10] : memref<1x420xf32, #tpu.memory_space<vmem>>, vector<1x420xf32>
    %27 = vector.broadcast %26 : vector<1x420xf32> to vector<8x420xf32>
    %28 = arith.mulf %25, %27 : vector<8x420xf32>
    %29 = arith.truncf %28 : vector<8x420xf32> to vector<8x420xbf16>
    %cst_11 = arith.constant 0.000000e+00 : f32
    %30 = vector.broadcast %cst_11 : f32 to vector<4x320xf32>
    %31 = vector.extract_strided_slice %29 {offsets = [0, 0], sizes = [8, 320], strides = [1, 1]} : vector<8x420xbf16> to vector<8x320xbf16>
    %c0_12 = arith.constant 0 : index
    %c0_13 = arith.constant 0 : index
    %c0_14 = arith.constant 0 : index
    %32 = vector.load %arg4[%c0_12, %c0_13, %c0_14] : memref<25x4x8xbf16, #tpu.memory_space<vmem>>, vector<1x4x8xbf16>
    %33 = vector.shape_cast %32 : vector<1x4x8xbf16> to vector<4x8xbf16>
    %cst_15 = arith.constant dense<0.000000e+00> : vector<4x320xf32>
    %34 = tpu.matmul %33, %31, %cst_15 {dimension_numbers = #tpu.dot_dimension_numbers<[1], [0], [0], [1], [0, 0, 1, 1], [], []>} : vector<4x8xbf16>, vector<8x320xbf16>, vector<4x320xf32> -> vector<4x320xf32>
    %35 = arith.addf %30, %34 : vector<4x320xf32>
    %36 = vector.extract_strided_slice %29 {offsets = [0, 1], sizes = [8, 320], strides = [1, 1]} : vector<8x420xbf16> to vector<8x320xbf16>
    %c1 = arith.constant 1 : index
    %c0_16 = arith.constant 0 : index
    %c0_17 = arith.constant 0 : index
    %37 = vector.load %arg4[%c1, %c0_16, %c0_17] : memref<25x4x8xbf16, #tpu.memory_space<vmem>>, vector<1x4x8xbf16>
    %38 = vector.shape_cast %37 : vector<1x4x8xbf16> to vector<4x8xbf16>
    %cst_18 = arith.constant dense<0.000000e+00> : vector<4x320xf32>
    %39 = tpu.matmul %38, %36, %cst_18 {dimension_numbers = #tpu.dot_dimension_numbers<[1], [0], [0], [1], [0, 0, 1, 1], [], []>} : vector<4x8xbf16>, vector<8x320xbf16>, vector<4x320xf32> -> vector<4x320xf32>
    %40 = arith.addf %35, %39 : vector<4x320xf32>
    %41 = vector.extract_strided_slice %29 {offsets = [0, 2], sizes = [8, 320], strides = [1, 1]} : vector<8x420xbf16> to vector<8x320xbf16>
    %c2 = arith.constant 2 : index
    %c0_19 = arith.constant 0 : index
    %c0_20 = arith.constant 0 : index
    %42 = vector.load %arg4[%c2, %c0_19, %c0_20] : memref<25x4x8xbf16, #tpu.memory_space<vmem>>, vector<1x4x8xbf16>
    %43 = vector.shape_cast %42 : vector<1x4x8xbf16> to vector<4x8xbf16>
    %cst_21 = arith.constant dense<0.000000e+00> : vector<4x320xf32>
    %44 = tpu.matmul %43, %41, %cst_21 {dimension_numbers = #tpu.dot_dimension_numbers<[1], [0], [0], [1], [0, 0, 1, 1], [], []>} : vector<4x8xbf16>, vector<8x320xbf16>, vector<4x320xf32> -> vector<4x320xf32>
    %45 = arith.addf %40, %44 : vector<4x320xf32>
    %46 = vector.extract_strided_slice %29 {offsets = [0, 3], sizes = [8, 320], strides = [1, 1]} : vector<8x420xbf16> to vector<8x320xbf16>
    %c3 = arith.constant 3 : index
    %c0_22 = arith.constant 0 : index
    %c0_23 = arith.constant 0 : index
    %47 = vector.load %arg4[%c3, %c0_22, %c0_23] : memref<25x4x8xbf16, #tpu.memory_space<vmem>>, vector<1x4x8xbf16>
    %48 = vector.shape_cast %47 : vector<1x4x8xbf16> to vector<4x8xbf16>
    %cst_24 = arith.constant dense<0.000000e+00> : vector<4x320xf32>
    %49 = tpu.matmul %48, %46, %cst_24 {dimension_numbers = #tpu.dot_dimension_numbers<[1], [0], [0], [1], [0, 0, 1, 1], [], []>} : vector<4x8xbf16>, vector<8x320xbf16>, vector<4x320xf32> -> vector<4x320xf32>
    %50 = arith.addf %45, %49 : vector<4x320xf32>
    %51 = vector.extract_strided_slice %29 {offsets = [0, 4], sizes = [8, 320], strides = [1, 1]} : vector<8x420xbf16> to vector<8x320xbf16>
    %c4 = arith.constant 4 : index
    %c0_25 = arith.constant 0 : index
    %c0_26 = arith.constant 0 : index
    %52 = vector.load %arg4[%c4, %c0_25, %c0_26] : memref<25x4x8xbf16, #tpu.memory_space<vmem>>, vector<1x4x8xbf16>
    %53 = vector.shape_cast %52 : vector<1x4x8xbf16> to vector<4x8xbf16>
    %cst_27 = arith.constant dense<0.000000e+00> : vector<4x320xf32>
    %54 = tpu.matmul %53, %51, %cst_27 {dimension_numbers = #tpu.dot_dimension_numbers<[1], [0], [0], [1], [0, 0, 1, 1], [], []>} : vector<4x8xbf16>, vector<8x320xbf16>, vector<4x320xf32> -> vector<4x320xf32>
    %55 = arith.addf %50, %54 : vector<4x320xf32>
    %56 = vector.extract_strided_slice %29 {offsets = [0, 20], sizes = [8, 320], strides = [1, 1]} : vector<8x420xbf16> to vector<8x320xbf16>
    %c5 = arith.constant 5 : index
    %c0_28 = arith.constant 0 : index
    %c0_29 = arith.constant 0 : index
    %57 = vector.load %arg4[%c5, %c0_28, %c0_29] : memref<25x4x8xbf16, #tpu.memory_space<vmem>>, vector<1x4x8xbf16>
    %58 = vector.shape_cast %57 : vector<1x4x8xbf16> to vector<4x8xbf16>
    %cst_30 = arith.constant dense<0.000000e+00> : vector<4x320xf32>
    %59 = tpu.matmul %58, %56, %cst_30 {dimension_numbers = #tpu.dot_dimension_numbers<[1], [0], [0], [1], [0, 0, 1, 1], [], []>} : vector<4x8xbf16>, vector<8x320xbf16>, vector<4x320xf32> -> vector<4x320xf32>
    %60 = arith.addf %55, %59 : vector<4x320xf32>
    %61 = vector.extract_strided_slice %29 {offsets = [0, 21], sizes = [8, 320], strides = [1, 1]} : vector<8x420xbf16> to vector<8x320xbf16>
    %c6 = arith.constant 6 : index
    %c0_31 = arith.constant 0 : index
    %c0_32 = arith.constant 0 : index
    %62 = vector.load %arg4[%c6, %c0_31, %c0_32] : memref<25x4x8xbf16, #tpu.memory_space<vmem>>, vector<1x4x8xbf16>
    %63 = vector.shape_cast %62 : vector<1x4x8xbf16> to vector<4x8xbf16>
    %cst_33 = arith.constant dense<0.000000e+00> : vector<4x320xf32>
    %64 = tpu.matmul %63, %61, %cst_33 {dimension_numbers = #tpu.dot_dimension_numbers<[1], [0], [0], [1], [0, 0, 1, 1], [], []>} : vector<4x8xbf16>, vector<8x320xbf16>, vector<4x320xf32> -> vector<4x320xf32>
    %65 = arith.addf %60, %64 : vector<4x320xf32>
    %66 = vector.extract_strided_slice %29 {offsets = [0, 22], sizes = [8, 320], strides = [1, 1]} : vector<8x420xbf16> to vector<8x320xbf16>
    %c7 = arith.constant 7 : index
    %c0_34 = arith.constant 0 : index
    %c0_35 = arith.constant 0 : index
    %67 = vector.load %arg4[%c7, %c0_34, %c0_35] : memref<25x4x8xbf16, #tpu.memory_space<vmem>>, vector<1x4x8xbf16>
    %68 = vector.shape_cast %67 : vector<1x4x8xbf16> to vector<4x8xbf16>
    %cst_36 = arith.constant dense<0.000000e+00> : vector<4x320xf32>
    %69 = tpu.matmul %68, %66, %cst_36 {dimension_numbers = #tpu.dot_dimension_numbers<[1], [0], [0], [1], [0, 0, 1, 1], [], []>} : vector<4x8xbf16>, vector<8x320xbf16>, vector<4x320xf32> -> vector<4x320xf32>
    %70 = arith.addf %65, %69 : vector<4x320xf32>
    %71 = vector.extract_strided_slice %29 {offsets = [0, 23], sizes = [8, 320], strides = [1, 1]} : vector<8x420xbf16> to vector<8x320xbf16>
    %c8 = arith.constant 8 : index
    %c0_37 = arith.constant 0 : index
    %c0_38 = arith.constant 0 : index
    %72 = vector.load %arg4[%c8, %c0_37, %c0_38] : memref<25x4x8xbf16, #tpu.memory_space<vmem>>, vector<1x4x8xbf16>
    %73 = vector.shape_cast %72 : vector<1x4x8xbf16> to vector<4x8xbf16>
    %cst_39 = arith.constant dense<0.000000e+00> : vector<4x320xf32>
    %74 = tpu.matmul %73, %71, %cst_39 {dimension_numbers = #tpu.dot_dimension_numbers<[1], [0], [0], [1], [0, 0, 1, 1], [], []>} : vector<4x8xbf16>, vector<8x320xbf16>, vector<4x320xf32> -> vector<4x320xf32>
    %75 = arith.addf %70, %74 : vector<4x320xf32>
    %76 = vector.extract_strided_slice %29 {offsets = [0, 24], sizes = [8, 320], strides = [1, 1]} : vector<8x420xbf16> to vector<8x320xbf16>
    %c9 = arith.constant 9 : index
    %c0_40 = arith.constant 0 : index
    %c0_41 = arith.constant 0 : index
    %77 = vector.load %arg4[%c9, %c0_40, %c0_41] : memref<25x4x8xbf16, #tpu.memory_space<vmem>>, vector<1x4x8xbf16>
    %78 = vector.shape_cast %77 : vector<1x4x8xbf16> to vector<4x8xbf16>
    %cst_42 = arith.constant dense<0.000000e+00> : vector<4x320xf32>
    %79 = tpu.matmul %78, %76, %cst_42 {dimension_numbers = #tpu.dot_dimension_numbers<[1], [0], [0], [1], [0, 0, 1, 1], [], []>} : vector<4x8xbf16>, vector<8x320xbf16>, vector<4x320xf32> -> vector<4x320xf32>
    %80 = arith.addf %75, %79 : vector<4x320xf32>
    %81 = vector.extract_strided_slice %29 {offsets = [0, 40], sizes = [8, 320], strides = [1, 1]} : vector<8x420xbf16> to vector<8x320xbf16>
    %c10 = arith.constant 10 : index
    %c0_43 = arith.constant 0 : index
    %c0_44 = arith.constant 0 : index
    %82 = vector.load %arg4[%c10, %c0_43, %c0_44] : memref<25x4x8xbf16, #tpu.memory_space<vmem>>, vector<1x4x8xbf16>
    %83 = vector.shape_cast %82 : vector<1x4x8xbf16> to vector<4x8xbf16>
    %cst_45 = arith.constant dense<0.000000e+00> : vector<4x320xf32>
    %84 = tpu.matmul %83, %81, %cst_45 {dimension_numbers = #tpu.dot_dimension_numbers<[1], [0], [0], [1], [0, 0, 1, 1], [], []>} : vector<4x8xbf16>, vector<8x320xbf16>, vector<4x320xf32> -> vector<4x320xf32>
    %85 = arith.addf %80, %84 : vector<4x320xf32>
    %86 = vector.extract_strided_slice %29 {offsets = [0, 41], sizes = [8, 320], strides = [1, 1]} : vector<8x420xbf16> to vector<8x320xbf16>
    %c11 = arith.constant 11 : index
    %c0_46 = arith.constant 0 : index
    %c0_47 = arith.constant 0 : index
    %87 = vector.load %arg4[%c11, %c0_46, %c0_47] : memref<25x4x8xbf16, #tpu.memory_space<vmem>>, vector<1x4x8xbf16>
    %88 = vector.shape_cast %87 : vector<1x4x8xbf16> to vector<4x8xbf16>
    %cst_48 = arith.constant dense<0.000000e+00> : vector<4x320xf32>
    %89 = tpu.matmul %88, %86, %cst_48 {dimension_numbers = #tpu.dot_dimension_numbers<[1], [0], [0], [1], [0, 0, 1, 1], [], []>} : vector<4x8xbf16>, vector<8x320xbf16>, vector<4x320xf32> -> vector<4x320xf32>
    %90 = arith.addf %85, %89 : vector<4x320xf32>
    %91 = vector.extract_strided_slice %29 {offsets = [0, 42], sizes = [8, 320], strides = [1, 1]} : vector<8x420xbf16> to vector<8x320xbf16>
    %c12 = arith.constant 12 : index
    %c0_49 = arith.constant 0 : index
    %c0_50 = arith.constant 0 : index
    %92 = vector.load %arg4[%c12, %c0_49, %c0_50] : memref<25x4x8xbf16, #tpu.memory_space<vmem>>, vector<1x4x8xbf16>
    %93 = vector.shape_cast %92 : vector<1x4x8xbf16> to vector<4x8xbf16>
    %cst_51 = arith.constant dense<0.000000e+00> : vector<4x320xf32>
    %94 = tpu.matmul %93, %91, %cst_51 {dimension_numbers = #tpu.dot_dimension_numbers<[1], [0], [0], [1], [0, 0, 1, 1], [], []>} : vector<4x8xbf16>, vector<8x320xbf16>, vector<4x320xf32> -> vector<4x320xf32>
    %95 = arith.addf %90, %94 : vector<4x320xf32>
    %96 = vector.extract_strided_slice %29 {offsets = [0, 43], sizes = [8, 320], strides = [1, 1]} : vector<8x420xbf16> to vector<8x320xbf16>
    %c13 = arith.constant 13 : index
    %c0_52 = arith.constant 0 : index
    %c0_53 = arith.constant 0 : index
    %97 = vector.load %arg4[%c13, %c0_52, %c0_53] : memref<25x4x8xbf16, #tpu.memory_space<vmem>>, vector<1x4x8xbf16>
    %98 = vector.shape_cast %97 : vector<1x4x8xbf16> to vector<4x8xbf16>
    %cst_54 = arith.constant dense<0.000000e+00> : vector<4x320xf32>
    %99 = tpu.matmul %98, %96, %cst_54 {dimension_numbers = #tpu.dot_dimension_numbers<[1], [0], [0], [1], [0, 0, 1, 1], [], []>} : vector<4x8xbf16>, vector<8x320xbf16>, vector<4x320xf32> -> vector<4x320xf32>
    %100 = arith.addf %95, %99 : vector<4x320xf32>
    %101 = vector.extract_strided_slice %29 {offsets = [0, 44], sizes = [8, 320], strides = [1, 1]} : vector<8x420xbf16> to vector<8x320xbf16>
    %c14 = arith.constant 14 : index
    %c0_55 = arith.constant 0 : index
    %c0_56 = arith.constant 0 : index
    %102 = vector.load %arg4[%c14, %c0_55, %c0_56] : memref<25x4x8xbf16, #tpu.memory_space<vmem>>, vector<1x4x8xbf16>
    %103 = vector.shape_cast %102 : vector<1x4x8xbf16> to vector<4x8xbf16>
    %cst_57 = arith.constant dense<0.000000e+00> : vector<4x320xf32>
    %104 = tpu.matmul %103, %101, %cst_57 {dimension_numbers = #tpu.dot_dimension_numbers<[1], [0], [0], [1], [0, 0, 1, 1], [], []>} : vector<4x8xbf16>, vector<8x320xbf16>, vector<4x320xf32> -> vector<4x320xf32>
    %105 = arith.addf %100, %104 : vector<4x320xf32>
    %106 = vector.extract_strided_slice %29 {offsets = [0, 60], sizes = [8, 320], strides = [1, 1]} : vector<8x420xbf16> to vector<8x320xbf16>
    %c15 = arith.constant 15 : index
    %c0_58 = arith.constant 0 : index
    %c0_59 = arith.constant 0 : index
    %107 = vector.load %arg4[%c15, %c0_58, %c0_59] : memref<25x4x8xbf16, #tpu.memory_space<vmem>>, vector<1x4x8xbf16>
    %108 = vector.shape_cast %107 : vector<1x4x8xbf16> to vector<4x8xbf16>
    %cst_60 = arith.constant dense<0.000000e+00> : vector<4x320xf32>
    %109 = tpu.matmul %108, %106, %cst_60 {dimension_numbers = #tpu.dot_dimension_numbers<[1], [0], [0], [1], [0, 0, 1, 1], [], []>} : vector<4x8xbf16>, vector<8x320xbf16>, vector<4x320xf32> -> vector<4x320xf32>
    %110 = arith.addf %105, %109 : vector<4x320xf32>
    %111 = vector.extract_strided_slice %29 {offsets = [0, 61], sizes = [8, 320], strides = [1, 1]} : vector<8x420xbf16> to vector<8x320xbf16>
    %c16 = arith.constant 16 : index
    %c0_61 = arith.constant 0 : index
    %c0_62 = arith.constant 0 : index
    %112 = vector.load %arg4[%c16, %c0_61, %c0_62] : memref<25x4x8xbf16, #tpu.memory_space<vmem>>, vector<1x4x8xbf16>
    %113 = vector.shape_cast %112 : vector<1x4x8xbf16> to vector<4x8xbf16>
    %cst_63 = arith.constant dense<0.000000e+00> : vector<4x320xf32>
    %114 = tpu.matmul %113, %111, %cst_63 {dimension_numbers = #tpu.dot_dimension_numbers<[1], [0], [0], [1], [0, 0, 1, 1], [], []>} : vector<4x8xbf16>, vector<8x320xbf16>, vector<4x320xf32> -> vector<4x320xf32>
    %115 = arith.addf %110, %114 : vector<4x320xf32>
    %116 = vector.extract_strided_slice %29 {offsets = [0, 62], sizes = [8, 320], strides = [1, 1]} : vector<8x420xbf16> to vector<8x320xbf16>
    %c17 = arith.constant 17 : index
    %c0_64 = arith.constant 0 : index
    %c0_65 = arith.constant 0 : index
    %117 = vector.load %arg4[%c17, %c0_64, %c0_65] : memref<25x4x8xbf16, #tpu.memory_space<vmem>>, vector<1x4x8xbf16>
    %118 = vector.shape_cast %117 : vector<1x4x8xbf16> to vector<4x8xbf16>
    %cst_66 = arith.constant dense<0.000000e+00> : vector<4x320xf32>
    %119 = tpu.matmul %118, %116, %cst_66 {dimension_numbers = #tpu.dot_dimension_numbers<[1], [0], [0], [1], [0, 0, 1, 1], [], []>} : vector<4x8xbf16>, vector<8x320xbf16>, vector<4x320xf32> -> vector<4x320xf32>
    %120 = arith.addf %115, %119 : vector<4x320xf32>
    %121 = vector.extract_strided_slice %29 {offsets = [0, 63], sizes = [8, 320], strides = [1, 1]} : vector<8x420xbf16> to vector<8x320xbf16>
    %c18 = arith.constant 18 : index
    %c0_67 = arith.constant 0 : index
    %c0_68 = arith.constant 0 : index
    %122 = vector.load %arg4[%c18, %c0_67, %c0_68] : memref<25x4x8xbf16, #tpu.memory_space<vmem>>, vector<1x4x8xbf16>
    %123 = vector.shape_cast %122 : vector<1x4x8xbf16> to vector<4x8xbf16>
    %cst_69 = arith.constant dense<0.000000e+00> : vector<4x320xf32>
    %124 = tpu.matmul %123, %121, %cst_69 {dimension_numbers = #tpu.dot_dimension_numbers<[1], [0], [0], [1], [0, 0, 1, 1], [], []>} : vector<4x8xbf16>, vector<8x320xbf16>, vector<4x320xf32> -> vector<4x320xf32>
    %125 = arith.addf %120, %124 : vector<4x320xf32>
    %126 = vector.extract_strided_slice %29 {offsets = [0, 64], sizes = [8, 320], strides = [1, 1]} : vector<8x420xbf16> to vector<8x320xbf16>
    %c19 = arith.constant 19 : index
    %c0_70 = arith.constant 0 : index
    %c0_71 = arith.constant 0 : index
    %127 = vector.load %arg4[%c19, %c0_70, %c0_71] : memref<25x4x8xbf16, #tpu.memory_space<vmem>>, vector<1x4x8xbf16>
    %128 = vector.shape_cast %127 : vector<1x4x8xbf16> to vector<4x8xbf16>
    %cst_72 = arith.constant dense<0.000000e+00> : vector<4x320xf32>
    %129 = tpu.matmul %128, %126, %cst_72 {dimension_numbers = #tpu.dot_dimension_numbers<[1], [0], [0], [1], [0, 0, 1, 1], [], []>} : vector<4x8xbf16>, vector<8x320xbf16>, vector<4x320xf32> -> vector<4x320xf32>
    %130 = arith.addf %125, %129 : vector<4x320xf32>
    %131 = vector.extract_strided_slice %29 {offsets = [0, 80], sizes = [8, 320], strides = [1, 1]} : vector<8x420xbf16> to vector<8x320xbf16>
    %c20 = arith.constant 20 : index
    %c0_73 = arith.constant 0 : index
    %c0_74 = arith.constant 0 : index
    %132 = vector.load %arg4[%c20, %c0_73, %c0_74] : memref<25x4x8xbf16, #tpu.memory_space<vmem>>, vector<1x4x8xbf16>
    %133 = vector.shape_cast %132 : vector<1x4x8xbf16> to vector<4x8xbf16>
    %cst_75 = arith.constant dense<0.000000e+00> : vector<4x320xf32>
    %134 = tpu.matmul %133, %131, %cst_75 {dimension_numbers = #tpu.dot_dimension_numbers<[1], [0], [0], [1], [0, 0, 1, 1], [], []>} : vector<4x8xbf16>, vector<8x320xbf16>, vector<4x320xf32> -> vector<4x320xf32>
    %135 = arith.addf %130, %134 : vector<4x320xf32>
    %136 = vector.extract_strided_slice %29 {offsets = [0, 81], sizes = [8, 320], strides = [1, 1]} : vector<8x420xbf16> to vector<8x320xbf16>
    %c21 = arith.constant 21 : index
    %c0_76 = arith.constant 0 : index
    %c0_77 = arith.constant 0 : index
    %137 = vector.load %arg4[%c21, %c0_76, %c0_77] : memref<25x4x8xbf16, #tpu.memory_space<vmem>>, vector<1x4x8xbf16>
    %138 = vector.shape_cast %137 : vector<1x4x8xbf16> to vector<4x8xbf16>
    %cst_78 = arith.constant dense<0.000000e+00> : vector<4x320xf32>
    %139 = tpu.matmul %138, %136, %cst_78 {dimension_numbers = #tpu.dot_dimension_numbers<[1], [0], [0], [1], [0, 0, 1, 1], [], []>} : vector<4x8xbf16>, vector<8x320xbf16>, vector<4x320xf32> -> vector<4x320xf32>
    %140 = arith.addf %135, %139 : vector<4x320xf32>
    %141 = vector.extract_strided_slice %29 {offsets = [0, 82], sizes = [8, 320], strides = [1, 1]} : vector<8x420xbf16> to vector<8x320xbf16>
    %c22 = arith.constant 22 : index
    %c0_79 = arith.constant 0 : index
    %c0_80 = arith.constant 0 : index
    %142 = vector.load %arg4[%c22, %c0_79, %c0_80] : memref<25x4x8xbf16, #tpu.memory_space<vmem>>, vector<1x4x8xbf16>
    %143 = vector.shape_cast %142 : vector<1x4x8xbf16> to vector<4x8xbf16>
    %cst_81 = arith.constant dense<0.000000e+00> : vector<4x320xf32>
    %144 = tpu.matmul %143, %141, %cst_81 {dimension_numbers = #tpu.dot_dimension_numbers<[1], [0], [0], [1], [0, 0, 1, 1], [], []>} : vector<4x8xbf16>, vector<8x320xbf16>, vector<4x320xf32> -> vector<4x320xf32>
    %145 = arith.addf %140, %144 : vector<4x320xf32>
    %146 = vector.extract_strided_slice %29 {offsets = [0, 83], sizes = [8, 320], strides = [1, 1]} : vector<8x420xbf16> to vector<8x320xbf16>
    %c23 = arith.constant 23 : index
    %c0_82 = arith.constant 0 : index
    %c0_83 = arith.constant 0 : index
    %147 = vector.load %arg4[%c23, %c0_82, %c0_83] : memref<25x4x8xbf16, #tpu.memory_space<vmem>>, vector<1x4x8xbf16>
    %148 = vector.shape_cast %147 : vector<1x4x8xbf16> to vector<4x8xbf16>
    %cst_84 = arith.constant dense<0.000000e+00> : vector<4x320xf32>
    %149 = tpu.matmul %148, %146, %cst_84 {dimension_numbers = #tpu.dot_dimension_numbers<[1], [0], [0], [1], [0, 0, 1, 1], [], []>} : vector<4x8xbf16>, vector<8x320xbf16>, vector<4x320xf32> -> vector<4x320xf32>
    %150 = arith.addf %145, %149 : vector<4x320xf32>
    %151 = vector.extract_strided_slice %29 {offsets = [0, 84], sizes = [8, 320], strides = [1, 1]} : vector<8x420xbf16> to vector<8x320xbf16>
    %c24 = arith.constant 24 : index
    %c0_85 = arith.constant 0 : index
    %c0_86 = arith.constant 0 : index
    %152 = vector.load %arg4[%c24, %c0_85, %c0_86] : memref<25x4x8xbf16, #tpu.memory_space<vmem>>, vector<1x4x8xbf16>
    %153 = vector.shape_cast %152 : vector<1x4x8xbf16> to vector<4x8xbf16>
    %cst_87 = arith.constant dense<0.000000e+00> : vector<4x320xf32>
    %154 = tpu.matmul %153, %151, %cst_87 {dimension_numbers = #tpu.dot_dimension_numbers<[1], [0], [0], [1], [0, 0, 1, 1], [], []>} : vector<4x8xbf16>, vector<8x320xbf16>, vector<4x320xf32> -> vector<4x320xf32>
    %155 = arith.addf %150, %154 : vector<4x320xf32>
    %c0_88 = arith.constant 0 : index
    %c0_89 = arith.constant 0 : index
    %156 = vector.load %arg5[%c0_88, %c0_89] : memref<4x1xf32, #tpu.memory_space<vmem>>, vector<4x1xf32>
    %157 = vector.broadcast %156 : vector<4x1xf32> to vector<4x320xf32>
    %158 = arith.addf %155, %157 : vector<4x320xf32>
    %c0_90 = arith.constant 0 : index
    %c0_91 = arith.constant 0 : index
    %c0_92 = arith.constant 0 : index
    %159 = vector.load %arg6[%c0_90, %c0_91, %c0_92] : memref<1x4x320xf32, #tpu.memory_space<vmem>>, vector<1x4x320xf32>
    %160 = vector.shape_cast %159 : vector<1x4x320xf32> to vector<4x320xf32>
    %161 = vector.shape_cast %158 : vector<4x320xf32> to vector<1x4x320xf32>
    tpu.vector_store %arg6[%c0_90, %c0_91, %c0_92], %161 {strides = array<i32>} : memref<1x4x320xf32, #tpu.memory_space<vmem>>, vector<1x4x320xf32>,
    return
  }
  func.func @transform_0(%arg0: i32) -> (i32, i32, i32) {
    %c0_i32 = arith.constant 0 : i32
    %c0_i32_0 = arith.constant 0 : i32
    %c0_i32_1 = arith.constant 0 : i32
    return %arg0, %c0_i32, %c0_i32_0 : i32, i32, i32
  }
  func.func @transform_1(%arg0: i32) -> (i32, i32) {
    %c0_i32 = arith.constant 0 : i32
    %c0_i32_0 = arith.constant 0 : i32
    %c0_i32_1 = arith.constant 0 : i32
    return %c0_i32, %c0_i32_0 : i32, i32
  }
  func.func @transform_2(%arg0: i32) -> (i32, i32) {
    %c0_i32 = arith.constant 0 : i32
    %c0_i32_0 = arith.constant 0 : i32
    %c0_i32_1 = arith.constant 0 : i32
    return %c0_i32, %c0_i32_0 : i32, i32
  }
  func.func @transform_3(%arg0: i32) -> (i32, i32, i32) {
    %c0_i32 = arith.constant 0 : i32
    %c0_i32_0 = arith.constant 0 : i32
    %c0_i32_1 = arith.constant 0 : i32
    %c0_i32_2 = arith.constant 0 : i32
    return %c0_i32, %c0_i32_0, %c0_i32_1 : i32, i32, i32
  }
  func.func @transform_4(%arg0: i32) -> (i32, i32) {
    %c0_i32 = arith.constant 0 : i32
    %c0_i32_0 = arith.constant 0 : i32
    %c0_i32_1 = arith.constant 0 : i32
    return %c0_i32, %c0_i32_0 : i32, i32
  }
  func.func @transform_5(%arg0: i32) -> (i32, i32, i32) {
    %c0_i32 = arith.constant 0 : i32
    %c0_i32_0 = arith.constant 0 : i32
    %c0_i32_1 = arith.constant 0 : i32
    return %arg0, %c0_i32, %c0_i32_0 : i32, i32, i32
  }
}

</mosaic_0001>

<bundles_post_ra>
// kernel: tpu_custom_call.1
= control target key start
LH: loop header
LB: loop body
LE: loop exit
PB: predicated region body
PF: predicated region fallthrough
CT: control target
= control target key end

     0   :  { %10 = vsyncpa [#allocation3], 0  ;;  %s4183_s0 = inlined_call_operand.vmem [shape: f32[2,8,420], index: 0, kind: input, shape index: {}]   ;;  %s4184_s1 = inlined_call_operand.vmem [shape: f32[1,420], index: 1, kind: input, shape index: {}]   ;;  %s4185_s2 = inlined_call_operand.vmem [shape: f32[8,1], index: 2, kind: input, shape index: {}]   ;;  %s4186_s3 = inlined_call_operand.vmem [shape: bf16[25,4,8], index: 3, kind: input, shape index: {}]   ;;  %s4187_s4 = inlined_call_operand.vmem [shape: f32[4,1], index: 4, kind: input, shape index: {}]   ;;  %s4188_s5 = inlined_call_operand.hbm [shape: f32[2,4,320], index: 5, kind: output, shape index: {}]  }
   0x1   :  { %12 = vsyncpa [#allocation3 + $0x1], 0  ;;  %s3578_s18 = smov 0   ;;  %s3580_s19 = smov 0  }
   0x2   :  { %s3582_s20 = smov 0   ;;  %s3584_s21 = smov 0  }
   0x3 LB: > { %s3599_s22 = sadd.s32 4294967295, %s3518_s21   ;;  %s3077_s23 = sadd.s32 4294967294, %s3518_s21   ;;  %s3518_s21 = sphi %s3584_s21, %s4194_s21   ;;  %s3514_s20 = sphi %s3582_s20, %s4193_s20   ;;  %s3510_s19 = sphi %s3580_s19, %s4192_s19   ;;  %s3506_s18 = sphi %s3578_s18, %s4191_s18  }
   0x4   : > { %s3603_s24 = sadd.s32 1, %s3518_s21   ;;  %s135_s25 = sadd.s32 1, %s3514_s20 }
   0x5   : > { %s132_s26 = ssub.s32 %s3518_s21, %s3603_s24  ;;  %p145_p0 = scmp.ne.s32.totalorder %s3514_s20, %s3510_s19 }
   0x6   : > { %p133_p1 = scmp.eq.s32.totalorder %s132_s26, 0  ;;  %p146_p2 = scmp.eq.s32.totalorder %s3599_s22, 1 }
   0x7   : > { %p151_p3 = scmp.ne.s32.totalorder %s3510_s19, %s3506_s18  ;;  %p152_p4 = scmp.eq.s32.totalorder %s3077_s23, 1 }
   0x8   : > { %s3614_s27 = scalar_select %p133_p1, %s3514_s20, %s135_s25  }
   0x9   : > { %p3616_p5 = por %p146_p2, %p145_p0  ;;  %p3620_p6 = por %p152_p4, %p151_p3 }
   0xa   : > { %p3080_p7 = scmp.ge.s32.totalorder %s3518_s21, 1  ;;  %p190_p8 = scmp.lt.s32.totalorder %s3518_s21, 3 }
   0xc   : > { %p191_p9 = pnand %p3080_p7, %p190_p8 }
   0xd   : > { %p218_p10 = scmp.lt.s32.totalorder (!%p191_p9), %s3599_s22, 1  ;;  %s3523_s14 = smov (!%p191_p9), 127  }
   0xe   : > { %194 = sbr.rel (%p191_p9) target bundleno = 734 (0x2de), region = 40  ;;  %s3524_s15 = smov (!%p191_p9), 125  }
   0xf   : > { %s3525_s16 = smov (!%p191_p9), 124   ;;  %s3526_s17 = smov (!%p191_p9), 126  }
  0x10   : > { %s3527_s23 = smov (!%p191_p9), 108   ;;  %s3528_s25 = smov (!%p191_p9), 107  }
  0x11   : > { %s3529_s26 = smov (!%p191_p9), 106   ;;  %s3530_s30 = smov (!%p191_p9), 105  }
  0x12   : > { %s3531_s6 = smov (!%p191_p9), 104   ;;  %s3534_s9 = smov (!%p191_p9), 86  }
  0x13   : > { %v259_v0 = vld [vmem:[%s4185_s2] sm:$0xff]  ;;  %v3520_v1 = vmov 0   ;;  %s219_s7 = scalar_select %p218_p10, %s3599_s22, 1  ;;  %vm230_vm0 = vcmask 293888   ;;  %v279_v18 = vlaneseq  ;;  %v3521_v45 = vmov 0.0  }
  0x14   : > { %3454 = vset.pattern.permute.xlu1 %v3520_v1  ;;  %368 = vmatprep.mubr.bf16.mxu0 %v3520_v1  ;;  %v277_v20 = vld [vmem:[%s4184_s1] sm:$0xf]  ;;  %vm3522_vm5 = vmmov 0   ;;  %s3535_s10 = smov 85   ;;  %s3537_s12 = smov 68   ;;  %vm319_vm6 = vcmask 1039360  }
  0x15   : > { %266 = vperm.xlu1 %3454, %v259_v0   ;;  %3455 = vset.pattern.permute.xlu0 %v3520_v1  ;;  %s3185_s8 = sshll.u32 %s219_s7, 5  ;;  %v280_v19 = vshrl.u32 %v279_v18, 7  ;;  %s3532_s7 = smov 88   ;;  %vm326_vm7 = vcmask 1043456   ;;  %vm322_vm8 = vcmask 64512   ;;  %vm518_vm9 = vcmask 1031168  }
  0x16   : > { %s222_s11 = scalar_lea.vmem %s4183_s0, %s3185_s8  ;;  %3236 = vmatprep.subr.bf16.mxu1 %v3521_v45  ;;  %3238 = vmatprep.mubr.msk.bf16.mxu1 %vm3522_vm5, %v3521_v45  ;;  %s3533_s8 = smov 87   ;;  %vm625_vm10 = vcmask 1022976   ;;  %vm732_vm11 = vcmask 1014784   ;;  %vm839_vm12 = vcmask 883712   ;;  %vm946_vm13 = vcmask 875520  }
  0x17   : > { %v224_v2 = vld [vmem:[%s222_s11] sm:$0xff]  ;;  %v225_v3 = vld [vmem:[%s222_s11 + $0x8] sm:$0xff]  ;;  %v226_v4 = vld [vmem:[%s222_s11 + $0x10] sm:$0xff]  ;;  %v293_v21 = vsub.s32 3, %v280_v19  ;;  %v281_v30 = vsub.s32 0, %v280_v19  ;;  %v285_v31 = vsub.s32 1, %v280_v19 }
  0x18   : > { %v227_v5 = vld [vmem:[%s222_s11 + $0x18] sm:$0xff]  ;;  %v228_v6 = vadd.f32 %v225_v3, %v224_v2  ;;  %v235_v7 = vmul.f32 %v224_v2, %v224_v2  ;;  %v236_v8 = vmul.f32 %v225_v3, %v225_v3  ;;  %v237_v9 = vmul.f32 %v226_v4, %v226_v4  ;;  %s3536_s11 = smov 84   ;;  %s3538_s13 = smov 67  }
  0x19   : > { %v231_v10 = vsel %vm230_vm0, %v227_v5, 0.0  ;;  %v238_v11 = vmul.f32 %v227_v5, %v227_v5  ;;  %v294_v22 = vrot.slane %v277_v20, %v293_v21  ;;  %v289_v37 = vsub.s32 2, %v280_v19 }
  0x1a   : > { %v229_v12 = vadd.f32 %v228_v6, %v226_v4  ;;  %v239_v13 = vadd.f32 %v236_v8, %v235_v7  ;;  %v282_v43 = vrot.slane %v277_v20, %v281_v30  ;;  %v286_v44 = vrot.slane %v277_v20, %v285_v31  ;;  %v3083_v8 = vld [vmem:[%s4186_s3 + $0x2] sm:$0x3] }
  0x1b   : > { %v241_v14 = vsel %vm230_vm0, %v238_v11, 0.0  ;;  %v290_v50 = vrot.slane %v277_v20, %v289_v37  ;;  %vm1053_vm14 = vcmask 867328   ;;  %vm1160_vm15 = vcmask 859136  }
  0x1c   : > { %v232_v15 = vadd.f32 %v231_v10, %v229_v12  ;;  %v240_v16 = vadd.f32 %v239_v13, %v237_v9  ;;  %vm1267_vm0 = vcmask 850944  }
  0x1e   : > { %233 = vadd.xlane.f32.xlu0 %v232_v15  ;;  %v242_v17 = vadd.f32 %v241_v14, %v240_v16  ;;  %v307_v15 = vld [vmem:[%s4186_s3] sm:$0x3] }
  0x22   : > { %243 = vadd.xlane.f32.xlu0 %v242_v17 }
  0x90   : > { %v267_v38 = vpop.permute.xlu1 %266 }
  0xa7   : > { %v234_v23 = vpop.xlane.xlu0 %233 }
  0xa8   : > { %v245_v24 = vmul.f32 0.00390625, %v234_v23 }
  0xaa   : > { %v247_v26 = vmul.f32 %v245_v24, %v245_v24  ;;  %v251_v32 = vsub.f32 %v224_v2, %v245_v24  ;;  %v252_v33 = vsub.f32 %v225_v3, %v245_v24  ;;  %v253_v34 = vsub.f32 %v226_v4, %v245_v24 }
  0xab   : > { %v244_v25 = vpop.xlane.xlu0 %243  ;;  %v254_v35 = vsub.f32 %v227_v5, %v245_v24  ;;  %v3090_v24 = vld [vmem:[%s4186_s3 + $0x4] sm:$0x3] }
  0xac   : > { %v246_v27 = vmul.f32 0.00390625, %v244_v25 }
  0xae   : > { %v248_v28 = vsub.f32 %v246_v27, %v247_v26 }
  0xb0   : > { %v249_v29 = vadd.f32 1e-05, %v248_v28 }
  0xb2   : > { %3456 = vrsqrt.f32 %v249_v29 }
  0xbf   : > { %v3457_v36 = vpop.eup %3456 }
  0xc0   : > { %v255_v39 = vmul.f32 %v3457_v36, %v251_v32  ;;  %v256_v40 = vmul.f32 %v3457_v36, %v252_v33  ;;  %v257_v41 = vmul.f32 %v3457_v36, %v253_v34  ;;  %v258_v42 = vmul.f32 %v3457_v36, %v254_v35  ;;  %v3094_v33 = vld [vmem:[%s4186_s3 + $0x6] sm:$0x3] }
  0xc2   : > { %vm260_vm1 = vcmp.ge.f32.partialorder %v255_v39, 0.0  ;;  %vm261_vm2 = vcmp.ge.f32.partialorder %v256_v40, 0.0  ;;  %vm262_vm3 = vcmp.ge.f32.partialorder %v257_v41, 0.0  ;;  %vm263_vm4 = vcmp.ge.f32.partialorder %v258_v42, 0.0 }
  0xc3   : > { %v269_v46 = vmul.f32 %v267_v38, %v255_v39  ;;  %v270_v47 = vmul.f32 %v267_v38, %v256_v40  ;;  %v271_v48 = vmul.f32 %v267_v38, %v257_v41  ;;  %v272_v49 = vmul.f32 %v267_v38, %v258_v42 }
  0xc5   : > { %v273_v51 = vsel %vm260_vm1, %v255_v39, %v269_v46  ;;  %v274_v52 = vsel %vm261_vm2, %v256_v40, %v270_v47  ;;  %v275_v53 = vsel %vm262_vm3, %v257_v41, %v271_v48  ;;  %v276_v54 = vsel %vm263_vm4, %v258_v42, %v272_v49 }
  0xc6   : > { %v299_v55 = vmul.f32 %v282_v43, %v273_v51  ;;  %v300_v56 = vmul.f32 %v286_v44, %v274_v52  ;;  %v3643_v57 = vmul.f32 %v294_v22, %v276_v54  ;;  %v301_v58 = vmul.f32 %v290_v50, %v275_v53  ;;  %v3098_v43 = vld [vmem:[%s4186_s3 + $0x8] sm:$0x3]  ;;  %v3102_v53 = vld [vmem:[%s4186_s3 + $0xa] sm:$0x3] }
  0xc7   : > { %vm1374_vm1 = vcmask 719872   ;;  %vm1481_vm2 = vcmask 711680   ;;  %vm1588_vm3 = vcmask 703488   ;;  %vm1695_vm4 = vcmask 695296  }
  0xc8   : > { %v3645_v59 = vpack.c.bf16 %v299_v55, %v299_v55  ;;  %v3647_v60 = vpack.c.bf16 %v300_v56, %v300_v56  ;;  %v3651_v61 = vpack.c.bf16 %v301_v58, %v301_v58  ;;  %v3708_v62 = vpack.c.bf16 %v3643_v57, %v3643_v57  ;;  %v2987_v55 = vld [vmem:[%s4187_s4] sm:$0xf] }
  0xca   : > { %315 = vrot.lane.b32.xlu0 %v3647_v60, %s3523_s14  ;;  %313 = vrot.lane.b32.xlu1 %v3645_v59, %s3523_s14  ;;  %v427_v11 = vsel %vm326_vm7, %v3651_v61, 0  ;;  %v421_v12 = vsel %vm326_vm7, %v3645_v59, 0 }
  0xce   : > { %623 = vrot.lane.b32.xlu0 %v3651_v61, %s3524_s15  ;;  %317 = vrot.lane.b32.xlu1 %v3651_v61, %s3523_s14  ;;  %s3539_s14 = smov 66  }
  0xd2   : > { %728 = vrot.lane.b32.xlu0 %v3647_v60, %s3525_s16  ;;  %512 = vrot.lane.b32.xlu1 %v3645_v59, %s3526_s17 }
  0xd6   : > { %833 = vrot.lane.b32.xlu0 %v3645_v59, %s3527_s23  ;;  %514 = vrot.lane.b32.xlu1 %v3647_v60, %s3526_s17 }
  0xda   : > { %837 = vrot.lane.b32.xlu0 %v3651_v61, %s3527_s23  ;;  %516 = vrot.lane.b32.xlu1 %v3651_v61, %s3526_s17  ;;  %s3542_s17 = smov 48  }
  0xde   : > { %942 = vrot.lane.b32.xlu0 %v3647_v60, %s3528_s25  ;;  %619 = vrot.lane.b32.xlu1 %v3645_v59, %s3524_s15 }
  0xe2   : > { %1047 = vrot.lane.b32.xlu0 %v3645_v59, %s3529_s26  ;;  %621 = vrot.lane.b32.xlu1 %v3647_v60, %s3524_s15  ;;  %s3540_s15 = smov 65  }
  0xe6   : > { %1051 = vrot.lane.b32.xlu0 %v3651_v61, %s3529_s26  ;;  %726 = vrot.lane.b32.xlu1 %v3645_v59, %s3525_s16 }
  0xea   : > { %1156 = vrot.lane.b32.xlu0 %v3647_v60, %s3530_s30  ;;  %730 = vrot.lane.b32.xlu1 %v3651_v61, %s3525_s16  ;;  %s3541_s16 = smov 64  }
  0xee   : > { %1261 = vrot.lane.b32.xlu0 %v3645_v59, %s3531_s6  ;;  %835 = vrot.lane.b32.xlu1 %v3647_v60, %s3527_s23  ;;  %s3543_s23 = smov 47  }
  0xf2   : > { %1265 = vrot.lane.b32.xlu0 %v3651_v61, %s3531_s6  ;;  %940 = vrot.lane.b32.xlu1 %v3645_v59, %s3528_s25 }
  0xf6   : > { %1370 = vrot.lane.b32.xlu0 %v3647_v60, %s3532_s7  ;;  %944 = vrot.lane.b32.xlu1 %v3651_v61, %s3528_s25  ;;  %s3544_s25 = smov 46  }
  0xfa   : > { %1475 = vrot.lane.b32.xlu0 %v3645_v59, %s3533_s8  ;;  %1049 = vrot.lane.b32.xlu1 %v3647_v60, %s3529_s26 }
  0xfe   : > { %1479 = vrot.lane.b32.xlu0 %v3651_v61, %s3533_s8  ;;  %1154 = vrot.lane.b32.xlu1 %v3645_v59, %s3530_s30 }
 0x102   : > { %1584 = vrot.lane.b32.xlu0 %v3647_v60, %s3534_s9  ;;  %1158 = vrot.lane.b32.xlu1 %v3651_v61, %s3530_s30 }
 0x106   : > { %1689 = vrot.lane.b32.xlu0 %v3645_v59, %s3535_s10  ;;  %1263 = vrot.lane.b32.xlu1 %v3647_v60, %s3531_s6  ;;  %s3545_s6 = smov 45  }
 0x10a   : > { %1693 = vrot.lane.b32.xlu0 %v3651_v61, %s3535_s10  ;;  %1368 = vrot.lane.b32.xlu1 %v3645_v59, %s3532_s7 }
 0x10e   : > { %1798 = vrot.lane.b32.xlu0 %v3647_v60, %s3536_s11  ;;  %1372 = vrot.lane.b32.xlu1 %v3651_v61, %s3532_s7 }
 0x112   : > { %1903 = vrot.lane.b32.xlu0 %v3645_v59, %s3537_s12  ;;  %1477 = vrot.lane.b32.xlu1 %v3647_v60, %s3533_s8 }
 0x116   : > { %1907 = vrot.lane.b32.xlu0 %v3651_v61, %s3537_s12  ;;  %1582 = vrot.lane.b32.xlu1 %v3645_v59, %s3534_s9 }
 0x11a   : > { %2012 = vrot.lane.b32.xlu0 %v3647_v60, %s3538_s13  ;;  %1586 = vrot.lane.b32.xlu1 %v3651_v61, %s3534_s9  ;;  %s3546_s9 = smov 44  }
 0x11e   : > { %2117 = vrot.lane.b32.xlu0 %v3645_v59, %s3539_s14  ;;  %1691 = vrot.lane.b32.xlu1 %v3647_v60, %s3535_s10  ;;  %s215_s10 = sand.u32 1, %s3510_s19  }
 0x122   : > { %2121 = vrot.lane.b32.xlu0 %v3651_v61, %s3539_s14  ;;  %1796 = vrot.lane.b32.xlu1 %v3645_v59, %s3536_s11 }
 0x126   : > { %2226 = vrot.lane.b32.xlu0 %v3647_v60, %s3540_s15  ;;  %1800 = vrot.lane.b32.xlu1 %v3651_v61, %s3536_s11  ;;  %s3386_s11 = smul.u32 12, %s215_s10 }
 0x12a   : > { %2331 = vrot.lane.b32.xlu0 %v3645_v59, %s3541_s16  ;;  %1905 = vrot.lane.b32.xlu1 %v3647_v60, %s3537_s12  ;;  %s217_s12 = scalar_lea.vmem [#allocation2], %s3386_s11 }
 0x12e   : > { %2335 = vrot.lane.b32.xlu0 %v3651_v61, %s3541_s16  ;;  %2010 = vrot.lane.b32.xlu1 %v3645_v59, %s3538_s13 }
 0x132   : > { %2441 = vrot.lane.b32.xlu0 %v3647_v60, %s3542_s17  ;;  %2014 = vrot.lane.b32.xlu1 %v3651_v61, %s3538_s13  ;;  %s3387_s13 = smul.u32 192, %s3599_s22  ;;  %s3547_s22 = smov [#allocation2]  }
 0x133   : > { %s3462_s26 = sshll.u32 %s3547_s22, 4  ;;  %s3463_s26 = int_to_ptr.vmem [resolvable:$false] %s3462_s26 }
 0x134   : > { %s3464_s30 = scalar_lea.vmem %s3463_s26, 384 }
 0x136   : > { %2445 = vrot.lane.b32.xlu0 %v3708_v62, %s3542_s17  ;;  %2119 = vrot.lane.b32.xlu1 %v3647_v60, %s3539_s14  ;;  %s3018_s14 = sshll.u32 %s217_s12, 4  ;;  %s3019_s14 = int_to_ptr.vmem [resolvable:$true] %s3018_s14 }
 0x137   : > { %p3465_p0 = scmp.lt.s32.totalorder %s3019_s14, %s3463_s26 }
 0x13a   : > { %2551 = vrot.lane.b32.xlu0 %v3647_v60, %s3543_s23  ;;  %2224 = vrot.lane.b32.xlu1 %v3645_v59, %s3540_s15 }
 0x13c   : > { %v316_v63 = vpop.permute.xlu0 %315  ;;  %v314_v0 = vpop.permute.xlu1 %313 }
 0x13d   : > { %v320_v4 = vsel %vm319_vm6, %v314_v0, %v316_v63 }
 0x13e   : > { %2555 = vrot.lane.b32.xlu0 %v3708_v62, %s3543_s23  ;;  %2228 = vrot.lane.b32.xlu1 %v3651_v61, %s3540_s15  ;;  %v328_v7 = vsel %vm326_vm7, %v320_v4, 0 }
 0x140   : > { %v3719_v2 = vpop.permute.xlu0 %623  ;;  %v318_v3 = vpop.permute.xlu1 %317 }
 0x141   : > { %v321_v5 = vsel %vm319_vm6, %v316_v63, %v318_v3  ;;  %v334_v6 = vsel %vm326_vm7, %v318_v3, 0  ;;  %v638_v29 = vsel %vm326_vm7, %v3719_v2, 0  ;;  %vm1802_vm6 = vcmask 687104  }
 0x142   : > { %2661 = vrot.lane.b32.xlu0 %v3647_v60, %s3544_s25  ;;  %2333 = vrot.lane.b32.xlu1 %v3647_v60, %s3541_s16 }
 0x143   : > { %3084 = vmatprep.subr.msk.bf16.mxu0 %vm326_vm7, %v321_v5  ;;  %3237 = vmatpush3.bf16.msra.mxu1 %v334_v6 }
 0x144   : > { %351 = vmatpush1.bf16.msra.mxu0 %v328_v7  ;;  %v3730_v9 = vpop.permute.xlu0 %728  ;;  %v513_v10 = vpop.permute.xlu1 %512  ;;  %3242 = vmatprep.subr.bf16.mxu1 %v3521_v45  ;;  %v3110_v7 = vld [vmem:[%s4186_s3 + $0xe] sm:$0x3] }
 0x145   : > { %3087 = vmatprep.subr.msk.bf16.mxu0 %vm326_vm7, %v3647_v60 }
 0x146   : > { %3239 = vmatmul.mubr.msk.bf16.vlgmr.msra.gmra.mxu1 %vm322_vm8, %v3083_v8  ;;  %2665 = vrot.lane.b32.xlu0 %v3708_v62, %s3544_s25 }
 0x147   : > { %2439 = vrot.lane.b32.xlu1 %v3645_v59, %s3542_s17  ;;  %3085 = vmatmul.mubr.msk.bf16.vlgmr.msra.gmra.mxu0 %vm322_vm8, %v3083_v8 }
 0x148   : > { %3243 = vmatpush3.bf16.msra.mxu1 %v427_v11  ;;  %444 = vmatpush1.bf16.msra.mxu0 %v421_v12  ;;  %v3745_v13 = vpop.permute.xlu0 %833  ;;  %v515_v14 = vpop.permute.xlu1 %514 }
 0x149   : > { %3244 = vmatprep.mubr.msk.bf16.mxu1 %vm3522_vm5, %v3521_v45  ;;  %461 = vmatprep.mubr.bf16.mxu0 %v3520_v1  ;;  %v519_v18 = vsel %vm518_vm9, %v513_v10, %v515_v14 }
 0x14a   : > { %2771 = vrot.lane.b32.xlu0 %v3647_v60, %s3545_s6  ;;  %3248 = vmatprep.subr.bf16.mxu1 %v3521_v45  ;;  %v525_v21 = vsel %vm326_vm7, %v519_v18, 0 }
 0x14b   : > { %2443 = vrot.lane.b32.xlu1 %v3651_v61, %s3542_s17  ;;  %s3016_s17 = scalar_lea.hbm %s4188_s5, %s3387_s13 }
 0x14c   : > { %v3758_v16 = vpop.permute.xlu0 %837  ;;  %v517_v17 = vpop.permute.xlu1 %516 }
 0x14d   : > { %v520_v19 = vsel %vm518_vm9, %v515_v14, %v517_v17  ;;  %v531_v20 = vsel %vm326_vm7, %v517_v17, 0  ;;  %v852_v48 = vsel %vm326_vm7, %v3758_v16, 0  ;;  %vm1909_vm9 = vcmask 556032  }
 0x14e   : > { %3245 = vmatmul.mubr.msk.bf16.vlgmr.msra.gmra.mxu1 %vm322_vm8, %v307_v15  ;;  %2775 = vrot.lane.b32.xlu0 %v3708_v62, %s3545_s6 }
 0x14f   : > { %2549 = vrot.lane.b32.xlu1 %v3645_v59, %s3543_s23  ;;  %3088 = vmatmul.mubr.msk.bf16.vlgmr.msra.gmra.mxu0 %vm322_vm8, %v307_v15 }
 0x150   : > { %3091 = vmatprep.subr.msk.bf16.mxu0 %vm326_vm7, %v520_v19  ;;  %3249 = vmatpush3.bf16.msra.mxu1 %v531_v20  ;;  %v3769_v22 = vpop.permute.xlu0 %942  ;;  %v620_v23 = vpop.permute.xlu1 %619 }
 0x151   : > { %548 = vmatpush1.bf16.msra.mxu0 %v525_v21  ;;  %3250 = vmatprep.mubr.msk.bf16.mxu1 %vm3522_vm5, %v3521_v45 }
 0x152   : > { %2881 = vrot.lane.b32.xlu0 %v3647_v60, %s3546_s9  ;;  %3254 = vmatprep.subr.bf16.mxu1 %v3521_v45 }
 0x153   : > { %2553 = vrot.lane.b32.xlu1 %v3651_v61, %s3543_s23  ;;  %565 = vmatprep.mubr.bf16.mxu0 %v3520_v1  ;;  %s3004_s23 = scalar_lea.sflag [#allocation3], %s215_s10 }
 0x154   : > { %v3782_v25 = vpop.permute.xlu0 %1047  ;;  %v622_v26 = vpop.permute.xlu1 %621 }
 0x155   : > { %v626_v27 = vsel %vm625_vm10, %v620_v23, %v622_v26  ;;  %v627_v28 = vsel %vm625_vm10, %v622_v26, %v3719_v2  ;;  %vm2016_vm10 = vcmask 547840  }
 0x156   : > { %v632_v30 = vsel %vm326_vm7, %v626_v27, 0  ;;  %3251 = vmatmul.mubr.msk.bf16.vlgmr.msra.gmra.mxu1 %vm322_vm8, %v3090_v24  ;;  %2885 = vrot.lane.b32.xlu0 %v3708_v62, %s3546_s9  ;;  %v3106_v62 = vld [vmem:[%s4186_s3 + $0xc] sm:$0x3] }
 0x157   : > { %3255 = vmatpush3.bf16.msra.mxu1 %v638_v29  ;;  %2659 = vrot.lane.b32.xlu1 %v3645_v59, %s3544_s25 }
 0x158   : > { %3092 = vmatmul.mubr.msk.bf16.vlgmr.msra.gmra.mxu0 %vm322_vm8, %v3090_v24  ;;  %3095 = vmatprep.subr.msk.bf16.mxu0 %vm326_vm7, %v627_v28  ;;  %v3795_v31 = vpop.permute.xlu0 %1051  ;;  %v727_v32 = vpop.permute.xlu1 %726  ;;  %v3118_v24 = vld [vmem:[%s4186_s3 + $0x12] sm:$0x3] }
 0x159   : > { %655 = vmatpush1.bf16.msra.mxu0 %v632_v30  ;;  %3256 = vmatprep.mubr.msk.bf16.mxu1 %vm3522_vm5, %v3521_v45  ;;  %v733_v36 = vsel %vm732_vm11, %v727_v32, %v3730_v9  ;;  %v1066_v2 = vsel %vm326_vm7, %v3795_v31, 0  ;;  %v3122_v32 = vld [vmem:[%s4186_s3 + $0x14] sm:$0x3] }
 0x15a   : > { %672 = vmatprep.mubr.bf16.mxu0 %v3520_v1  ;;  %3260 = vmatprep.subr.bf16.mxu1 %v3521_v45  ;;  %v739_v39 = vsel %vm326_vm7, %v733_v36, 0 }
 0x15b   : > { %2663 = vrot.lane.b32.xlu1 %v3651_v61, %s3544_s25  ;;  %s3458_s25 = scalar_lea.vmem %s3019_s14, 192 }
 0x15c   : > { %v3806_v34 = vpop.permute.xlu0 %1156  ;;  %v731_v35 = vpop.permute.xlu1 %730  ;;  %p3459_p11 = scmp.ne.s32.totalorder %s3019_s14, %s3458_s25  ;;  %p3466_p1 = scmp.lt.s32.totalorder %s3464_s30, %s3458_s25 }
 0x15d   : > { %v734_v37 = vsel %vm732_vm11, %v3730_v9, %v731_v35  ;;  %v745_v38 = vsel %vm326_vm7, %v731_v35, 0  ;;  %vm2123_vm11 = vcmask 539648  }
 0x15e   : > { %3257 = vmatmul.mubr.msk.bf16.vlgmr.msra.gmra.mxu1 %vm322_vm8, %v3094_v33  ;;  %3099 = vmatprep.subr.msk.bf16.mxu0 %vm326_vm7, %v734_v37  ;;  %p3460_p12 = pnand %p3459_p11, %p3616_p5  ;;  %p3467_p2 = por %p3466_p1, %p3465_p0 }
 0x15f   : > { %2769 = vrot.lane.b32.xlu1 %v3645_v59, %s3545_s6  ;;  %3261 = vmatpush3.bf16.msra.mxu1 %v745_v38 }
 0x160   : > { %3096 = vmatmul.mubr.msk.bf16.vlgmr.msra.gmra.mxu0 %vm322_vm8, %v3094_v33  ;;  %v3817_v40 = vpop.permute.xlu0 %1261  ;;  %v836_v41 = vpop.permute.xlu1 %835  ;;  %3262 = vmatprep.mubr.msk.bf16.mxu1 %vm3522_vm5, %v3521_v45  ;;  %p3461_p13 = pneg %p3460_p12 }
 0x161   : > { %762 = vmatpush1.bf16.msra.mxu0 %v739_v39  ;;  %v841_v42 = vsel %vm839_vm12, %v836_v41, %v3758_v16  ;;  %3266 = vmatprep.subr.bf16.mxu1 %v3521_v45  ;;  %v840_v47 = vsel %vm839_vm12, %v3745_v13, %v836_v41  ;;  %v3114_v16 = vld [vmem:[%s4186_s3 + $0x10] sm:$0x3]  ;;  %v3126_v41 = vld [vmem:[%s4186_s3 + $0x16] sm:$0x3]  ;;  %vm2230_vm12 = vcmask 531456  }
 0x162   : > { %3103 = vmatprep.subr.msk.bf16.mxu0 %vm326_vm7, %v841_v42  ;;  %779 = vmatprep.mubr.bf16.mxu0 %v3520_v1  ;;  %v846_v49 = vsel %vm326_vm7, %v840_v47, 0  ;;  %p3468_p3 = pnand %p3467_p2, %p3461_p13 }
 0x163   : > { %2773 = vrot.lane.b32.xlu1 %v3651_v61, %s3545_s6 }
 0x164   : > { %v3831_v44 = vpop.permute.xlu0 %1265  ;;  %v941_v46 = vpop.permute.xlu1 %940 }
 0x165   : > { %v947_v56 = vsel %vm946_vm13, %v941_v46, %v3769_v22  ;;  %v1280_v19 = vsel %vm326_vm7, %v3831_v44, 0 }
 0x166   : > { %3263 = vmatmul.mubr.msk.bf16.vlgmr.msra.gmra.mxu1 %vm322_vm8, %v3098_v43 }
 0x167   : > { %3267 = vmatpush3.bf16.msra.mxu1 %v852_v48  ;;  %2879 = vrot.lane.b32.xlu1 %v3645_v59, %s3546_s9  ;;  %v953_v59 = vsel %vm326_vm7, %v947_v56, 0 }
 0x168   : > { %3100 = vmatmul.mubr.msk.bf16.vlgmr.msra.gmra.mxu0 %vm322_vm8, %v3098_v43  ;;  %v945_v50 = vpop.permute.xlu1 %944  ;;  %3268 = vmatprep.mubr.msk.bf16.mxu1 %vm3522_vm5, %v3521_v45  ;;  %v3846_v52 = vpop.permute.xlu0 %1370 }
 0x169   : > { %869 = vmatpush1.bf16.msra.mxu0 %v846_v49  ;;  %v948_v51 = vsel %vm946_vm13, %v3769_v22, %v945_v50  ;;  %3272 = vmatprep.subr.bf16.mxu1 %v3521_v45  ;;  %v959_v57 = vsel %vm326_vm7, %v945_v50, 0  ;;  %v3130_v50 = vld [vmem:[%s4186_s3 + $0x18] sm:$0x3]  ;;  %vm2337_vm13 = vcmask 523264  }
 0x16a   : > { %3107 = vmatprep.subr.msk.bf16.mxu0 %vm326_vm7, %v948_v51  ;;  %886 = vmatprep.mubr.bf16.mxu0 %v3520_v1 }
 0x16b   : > { %2883 = vrot.lane.b32.xlu1 %v3651_v61, %s3546_s9 }
 0x16c   : > { %v1050_v54 = vpop.permute.xlu1 %1049  ;;  %v3864_v60 = vpop.permute.xlu0 %1475 }
 0x16d   : > { %v1055_v58 = vsel %vm1053_vm14, %v1050_v54, %v3795_v31  ;;  %v1054_v0 = vsel %vm1053_vm14, %v3782_v25, %v1050_v54  ;;  %vm2447_vm14 = vcmask 392192  }
 0x16e   : > { %3269 = vmatmul.mubr.msk.bf16.vlgmr.msra.gmra.mxu1 %vm322_vm8, %v3102_v53  ;;  %v1060_v5 = vsel %vm326_vm7, %v1054_v0, 0 }
 0x16f   : > { %3273 = vmatpush3.bf16.msra.mxu1 %v959_v57  ;;  %2990 = vperm.xlu1 %3454, %v2987_v55  }
 0x170   : > { %3104 = vmatmul.mubr.msk.bf16.vlgmr.msra.gmra.mxu0 %vm322_vm8, %v3102_v53  ;;  %v1155_v61 = vpop.permute.xlu1 %1154  ;;  %3274 = vmatprep.mubr.msk.bf16.mxu1 %vm3522_vm5, %v3521_v45  ;;  %v3879_v3 = vpop.permute.xlu0 %1479 }
 0x171   : > { %976 = vmatpush1.bf16.msra.mxu0 %v953_v59  ;;  %3278 = vmatprep.subr.bf16.mxu1 %v3521_v45  ;;  %v1161_v10 = vsel %vm1160_vm15, %v1155_v61, %v3806_v34  ;;  %v1494_v36 = vsel %vm326_vm7, %v3879_v3, 0 }
 0x172   : > { %3111 = vmatprep.subr.msk.bf16.mxu0 %vm326_vm7, %v1055_v58  ;;  %993 = vmatprep.mubr.bf16.mxu0 %v3520_v1  ;;  %v1167_v12 = vsel %vm326_vm7, %v1161_v10, 0  ;;  %v3134_v58 = vld [vmem:[%s4186_s3 + $0x1a] sm:$0x3] }
 0x174   : > { %v1159_v63 = vpop.permute.xlu1 %1158  ;;  %v3893_v8 = vpop.permute.xlu0 %1584 }
 0x175   : > { %v1162_v4 = vsel %vm1160_vm15, %v3806_v34, %v1159_v63  ;;  %v1173_v11 = vsel %vm326_vm7, %v1159_v63, 0  ;;  %vm2557_vm15 = vcmask 384000  }
 0x176   : > { %3275 = vmatmul.mubr.msk.bf16.vlgmr.msra.gmra.mxu1 %vm322_vm8, %v3106_v62 }
 0x177   : > { %3279 = vmatpush3.bf16.msra.mxu1 %v1066_v2  ;;  %3280 = vmatprep.mubr.msk.bf16.mxu1 %vm3522_vm5, %v3521_v45 }
 0x178   : > { %3108 = vmatmul.mubr.msk.bf16.vlgmr.msra.gmra.mxu0 %vm322_vm8, %v3106_v62  ;;  %v1264_v6 = vpop.permute.xlu1 %1263  ;;  %3284 = vmatprep.subr.bf16.mxu1 %v3521_v45  ;;  %v3905_v15 = vpop.permute.xlu0 %1689 }
 0x179   : > { %1083 = vmatpush1.bf16.msra.mxu0 %v1060_v5  ;;  %1100 = vmatprep.mubr.bf16.mxu0 %v3520_v1  ;;  %v1269_v14 = vsel %vm1267_vm0, %v1264_v6, %v3831_v44  ;;  %v1268_v18 = vsel %vm1267_vm0, %v3817_v40, %v1264_v6  ;;  %vm2667_vm0 = vcmask 375808  }
 0x17a   : > { %3115 = vmatprep.subr.msk.bf16.mxu0 %vm326_vm7, %v1162_v4  ;;  %v1274_v20 = vsel %vm326_vm7, %v1268_v18, 0  ;;  %v3146_v18 = vld [vmem:[%s4186_s3 + $0x20] sm:$0x3] }
 0x17c   : > { %v1369_v9 = vpop.permute.xlu1 %1368  ;;  %v3918_v21 = vpop.permute.xlu0 %1693 }
 0x17d   : > { %v1375_v26 = vsel %vm1374_vm1, %v1369_v9, %v3846_v52  ;;  %v1708_v53 = vsel %vm326_vm7, %v3918_v21, 0 }
 0x17e   : > { %3281 = vmatmul.mubr.msk.bf16.vlgmr.msra.gmra.mxu1 %vm322_vm8, %v3110_v7  ;;  %v1381_v29 = vsel %vm326_vm7, %v1375_v26, 0  ;;  %v3150_v26 = vld [vmem:[%s4186_s3 + $0x22] sm:$0x3] }
 0x17f   : > { %3285 = vmatpush3.bf16.msra.mxu1 %v1173_v11  ;;  %3286 = vmatprep.mubr.msk.bf16.mxu1 %vm3522_vm5, %v3521_v45  ;;  %v3142_v11 = vld [vmem:[%s4186_s3 + $0x1e] sm:$0x3] }
 0x180   : > { %3112 = vmatmul.mubr.msk.bf16.vlgmr.msra.gmra.mxu0 %vm322_vm8, %v3110_v7  ;;  %v1373_v13 = vpop.permute.xlu1 %1372  ;;  %3290 = vmatprep.subr.bf16.mxu1 %v3521_v45  ;;  %v3929_v27 = vpop.permute.xlu0 %1798 }
 0x181   : > { %1190 = vmatpush1.bf16.msra.mxu0 %v1167_v12  ;;  %1207 = vmatprep.mubr.bf16.mxu0 %v3520_v1  ;;  %v1376_v23 = vsel %vm1374_vm1, %v3846_v52, %v1373_v13  ;;  %v1387_v28 = vsel %vm326_vm7, %v1373_v13, 0  ;;  %vm2777_vm1 = vcmask 367616  }
 0x182   : > { %3119 = vmatprep.subr.msk.bf16.mxu0 %vm326_vm7, %v1269_v14 }
 0x184   : > { %v1478_v17 = vpop.permute.xlu1 %1477  ;;  %v3944_v33 = vpop.permute.xlu0 %1903 }
 0x185   : > { %v1483_v31 = vsel %vm1481_vm2, %v1478_v17, %v3879_v3  ;;  %v1482_v35 = vsel %vm1481_vm2, %v3864_v60, %v1478_v17  ;;  %v3138_v3 = vld [vmem:[%s4186_s3 + $0x1c] sm:$0x3]  ;;  %vm2887_vm2 = vcmask 359424  }
 0x186   : > { %3287 = vmatmul.mubr.msk.bf16.vlgmr.msra.gmra.mxu1 %vm322_vm8, %v3114_v16  ;;  %v1488_v37 = vsel %vm326_vm7, %v1482_v35, 0 }
 0x187   : > { %3291 = vmatpush3.bf16.msra.mxu1 %v1280_v19  ;;  %3292 = vmatprep.mubr.msk.bf16.mxu1 %vm3522_vm5, %v3521_v45 }
 0x188   : > { %3116 = vmatmul.mubr.msk.bf16.vlgmr.msra.gmra.mxu0 %vm322_vm8, %v3114_v16  ;;  %v1583_v22 = vpop.permute.xlu1 %1582  ;;  %3296 = vmatprep.subr.bf16.mxu1 %v3521_v45  ;;  %v1908_v40 = vpop.permute.xlu0 %1907 }
 0x189   : > { %1297 = vmatpush1.bf16.msra.mxu0 %v1274_v20  ;;  %1314 = vmatprep.mubr.bf16.mxu0 %v3520_v1  ;;  %v1589_v43 = vsel %vm1588_vm3, %v1583_v22, %v3893_v8  ;;  %v1922_v6 = vsel %vm326_vm7, %v1908_v40, 0 }
 0x18a   : > { %3123 = vmatprep.subr.msk.bf16.mxu0 %vm326_vm7, %v1376_v23  ;;  %v1595_v46 = vsel %vm326_vm7, %v1589_v43, 0 }
 0x18c   : > { %v1587_v25 = vpop.permute.xlu1 %1586  ;;  %v2013_v47 = vpop.permute.xlu0 %2012 }
 0x18d   : > { %v1590_v39 = vsel %vm1588_vm3, %v3893_v8, %v1587_v25  ;;  %v1601_v44 = vsel %vm326_vm7, %v1587_v25, 0 }
 0x18e   : > { %3293 = vmatmul.mubr.msk.bf16.vlgmr.msra.gmra.mxu1 %vm322_vm8, %v3118_v24 }
 0x18f   : > { %3297 = vmatpush3.bf16.msra.mxu1 %v1387_v28  ;;  %3298 = vmatprep.mubr.msk.bf16.mxu1 %vm3522_vm5, %v3521_v45 }
 0x190   : > { %3120 = vmatmul.mubr.msk.bf16.vlgmr.msra.gmra.mxu0 %vm322_vm8, %v3118_v24  ;;  %v1692_v30 = vpop.permute.xlu1 %1691  ;;  %3302 = vmatprep.subr.bf16.mxu1 %v3521_v45  ;;  %v3978_v54 = vpop.permute.xlu0 %2117 }
 0x191   : > { %1404 = vmatpush1.bf16.msra.mxu0 %v1381_v29  ;;  %1421 = vmatprep.mubr.bf16.mxu0 %v3520_v1  ;;  %v1697_v49 = vsel %vm1695_vm4, %v1692_v30, %v3918_v21  ;;  %v1696_v52 = vsel %vm1695_vm4, %v3905_v15, %v1692_v30 }
 0x192   : > { %3127 = vmatprep.subr.msk.bf16.mxu0 %vm326_vm7, %v1483_v31  ;;  %v1702_v55 = vsel %vm326_vm7, %v1696_v52, 0  ;;  %v3162_v52 = vld [vmem:[%s4186_s3 + $0x28] sm:$0x3] }
 0x194   : > { %v1797_v34 = vpop.permute.xlu1 %1796  ;;  %v2122_v59 = vpop.permute.xlu0 %2121 }
 0x195   : > { %v1803_v60 = vsel %vm1802_vm6, %v1797_v34, %v3929_v27  ;;  %v2136_v21 = vsel %vm326_vm7, %v2122_v59, 0  ;;  %v3154_v34 = vld [vmem:[%s4186_s3 + $0x24] sm:$0x3] }
 0x196   : > { %3299 = vmatmul.mubr.msk.bf16.vlgmr.msra.gmra.mxu1 %vm322_vm8, %v3122_v32  ;;  %v1809_v63 = vsel %vm326_vm7, %v1803_v60, 0 }
 0x197   : > { %3303 = vmatpush3.bf16.msra.mxu1 %v1494_v36  ;;  %3304 = vmatprep.mubr.msk.bf16.mxu1 %vm3522_vm5, %v3521_v45 }
 0x198   : > { %3124 = vmatmul.mubr.msk.bf16.vlgmr.msra.gmra.mxu0 %vm322_vm8, %v3122_v32  ;;  %v1801_v38 = vpop.permute.xlu1 %1800  ;;  %3308 = vmatprep.subr.bf16.mxu1 %v3521_v45  ;;  %v2227_v2 = vpop.permute.xlu0 %2226 }
 0x199   : > { %1511 = vmatpush1.bf16.msra.mxu0 %v1488_v37  ;;  %1528 = vmatprep.mubr.bf16.mxu0 %v3520_v1  ;;  %v1804_v57 = vsel %vm1802_vm6, %v3929_v27, %v1801_v38  ;;  %v1815_v61 = vsel %vm326_vm7, %v1801_v38, 0 }
 0x19a   : > { %3131 = vmatprep.subr.msk.bf16.mxu0 %vm326_vm7, %v1590_v39 }
 0x19c   : > { %v1906_v42 = vpop.permute.xlu1 %1905  ;;  %v2332_v7 = vpop.permute.xlu0 %2331 }
 0x19d   : > { %v1911_v0 = vsel %vm1909_vm9, %v1906_v42, %v1908_v40  ;;  %v1910_v5 = vsel %vm1909_vm9, %v3944_v33, %v1906_v42  ;;  %v3158_v42 = vld [vmem:[%s4186_s3 + $0x26] sm:$0x3] }
 0x19e   : > { %3305 = vmatmul.mubr.msk.bf16.vlgmr.msra.gmra.mxu1 %vm322_vm8, %v3126_v41  ;;  %v1916_v8 = vsel %vm326_vm7, %v1910_v5, 0 }
 0x19f   : > { %3309 = vmatpush3.bf16.msra.mxu1 %v1601_v44  ;;  %3310 = vmatprep.mubr.msk.bf16.mxu1 %vm3522_vm5, %v3521_v45 }
 0x1a0   : > { %3128 = vmatmul.mubr.msk.bf16.vlgmr.msra.gmra.mxu0 %vm322_vm8, %v3126_v41  ;;  %v2011_v48 = vpop.permute.xlu1 %2010  ;;  %3314 = vmatprep.subr.bf16.mxu1 %v3521_v45  ;;  %v2336_v13 = vpop.permute.xlu0 %2335 }
 0x1a1   : > { %1618 = vmatpush1.bf16.msra.mxu0 %v1595_v46  ;;  %1635 = vmatprep.mubr.bf16.mxu0 %v3520_v1  ;;  %v2017_v12 = vsel %vm2016_vm10, %v2011_v48, %v2013_v47  ;;  %v2350_v36 = vsel %vm326_vm7, %v2336_v13, 0 }
 0x1a2   : > { %3135 = vmatprep.subr.msk.bf16.mxu0 %vm326_vm7, %v1697_v49  ;;  %v2023_v15 = vsel %vm326_vm7, %v2017_v12, 0 }
 0x1a4   : > { %v2015_v51 = vpop.permute.xlu1 %2014  ;;  %v2442_v19 = vpop.permute.xlu0 %2441 }
 0x1a5   : > { %v2018_v9 = vsel %vm2016_vm10, %v2013_v47, %v2015_v51  ;;  %v2029_v14 = vsel %vm326_vm7, %v2015_v51, 0 }
 0x1a6   : > { %3311 = vmatmul.mubr.msk.bf16.vlgmr.msra.gmra.mxu1 %vm322_vm8, %v3130_v50 }
 0x1a7   : > { %3315 = vmatpush3.bf16.msra.mxu1 %v1708_v53  ;;  %3316 = vmatprep.mubr.msk.bf16.mxu1 %vm3522_vm5, %v3521_v45 }
 0x1a8   : > { %3132 = vmatmul.mubr.msk.bf16.vlgmr.msra.gmra.mxu0 %vm322_vm8, %v3130_v50  ;;  %v2120_v56 = vpop.permute.xlu1 %2119  ;;  %3320 = vmatprep.subr.bf16.mxu1 %v3521_v45  ;;  %v2446_v25 = vpop.permute.xlu0 %2445 }
 0x1a9   : > { %1725 = vmatpush1.bf16.msra.mxu0 %v1702_v55  ;;  %1742 = vmatprep.mubr.bf16.mxu0 %v3520_v1  ;;  %v2125_v17 = vsel %vm2123_vm11, %v2120_v56, %v2122_v59  ;;  %v2124_v20 = vsel %vm2123_vm11, %v3978_v54, %v2120_v56 }
 0x1aa   : > { %3139 = vmatprep.subr.msk.bf16.mxu0 %vm326_vm7, %v1804_v57  ;;  %v2130_v23 = vsel %vm326_vm7, %v2124_v20, 0 }
 0x1ac   : > { %v3994_v62 = vpop.permute.xlu1 %2224  ;;  %v2552_v30 = vpop.permute.xlu0 %2551 }
 0x1ad   : > { %v2231_v28 = vsel %vm2230_vm12, %v3994_v62, %v2227_v2 }
 0x1ae   : > { %3317 = vmatmul.mubr.msk.bf16.vlgmr.msra.gmra.mxu1 %vm322_vm8, %v3134_v58  ;;  %v2237_v31 = vsel %vm326_vm7, %v2231_v28, 0 }
 0x1af   : > { %3321 = vmatpush3.bf16.msra.mxu1 %v1815_v61  ;;  %3322 = vmatprep.mubr.msk.bf16.mxu1 %vm3522_vm5, %v3521_v45  ;;  %v3166_v61 = vld [vmem:[%s4186_s3 + $0x2a] sm:$0x3] }
 0x1b0   : > { %3136 = vmatmul.mubr.msk.bf16.vlgmr.msra.gmra.mxu0 %vm322_vm8, %v3134_v58  ;;  %3326 = vmatprep.subr.bf16.mxu1 %v3521_v45  ;;  %v2229_v4 = vpop.permute.xlu1 %2228  ;;  %v2556_v37 = vpop.permute.xlu0 %2555 }
 0x1b1   : > { %1832 = vmatpush1.bf16.msra.mxu0 %v1809_v63  ;;  %1849 = vmatprep.mubr.bf16.mxu0 %v3520_v1  ;;  %v2232_v24 = vsel %vm2230_vm12, %v2227_v2, %v2229_v4  ;;  %v2243_v29 = vsel %vm326_vm7, %v2229_v4, 0 }
 0x1b2   : > { %3143 = vmatprep.subr.msk.bf16.mxu0 %vm326_vm7, %v1911_v0 }
 0x1b4   : > { %v2334_v10 = vpop.permute.xlu1 %2333  ;;  %v2662_v43 = vpop.permute.xlu0 %2661 }
 0x1b5   : > { %v2339_v32 = vsel %vm2337_vm13, %v2334_v10, %v2336_v13  ;;  %v2338_v35 = vsel %vm2337_vm13, %v2332_v7, %v2334_v10 }
 0x1b6   : > { %3323 = vmatmul.mubr.msk.bf16.vlgmr.msra.gmra.mxu1 %vm322_vm8, %v3138_v3  ;;  %v2344_v38 = vsel %vm326_vm7, %v2338_v35, 0 }
 0x1b7   : > { %3327 = vmatpush3.bf16.msra.mxu1 %v1922_v6  ;;  %3328 = vmatprep.mubr.msk.bf16.mxu1 %vm3522_vm5, %v3521_v45  ;;  %v3170_v6 = vld [vmem:[%s4186_s3 + $0x2c] sm:$0x3] }
 0x1b8   : > { %3140 = vmatmul.mubr.msk.bf16.vlgmr.msra.gmra.mxu0 %vm322_vm8, %v3138_v3  ;;  %3332 = vmatprep.subr.bf16.mxu1 %v3521_v45  ;;  %v2666_v50 = vpop.permute.xlu0 %2665 }
 0x1b9   : > { %1939 = vmatpush1.bf16.msra.mxu0 %v1916_v8  ;;  %1956 = vmatprep.mubr.bf16.mxu0 %v3520_v1  ;;  %v2440_v16 = vpop.permute.xlu1 %2439 }
 0x1ba   : > { %3147 = vmatprep.subr.msk.bf16.mxu0 %vm326_vm7, %v2018_v9  ;;  %v2448_v44 = vsel %vm2447_vm14, %v2440_v16, %v2442_v19 }
 0x1bb   : > { %v2455_v48 = vsel %vm326_vm7, %v2448_v44, 0 }
 0x1bc   : > { %v2772_v56 = vpop.permute.xlu0 %2771 }
 0x1bd   : > { %v2444_v22 = vpop.permute.xlu1 %2443 }
 0x1be   : > { %3329 = vmatmul.mubr.msk.bf16.vlgmr.msra.gmra.mxu1 %vm322_vm8, %v3142_v11  ;;  %v2449_v40 = vsel %vm2447_vm14, %v2442_v19, %v2444_v22  ;;  %v2450_v41 = vsel %vm2447_vm14, %v2444_v22, %v2446_v25  ;;  %v3178_v19 = vld [vmem:[%s4186_s3 + $0x30] sm:$0x3] }
 0x1bf   : > { %3333 = vmatpush3.bf16.msra.mxu1 %v2029_v14  ;;  %3334 = vmatprep.mubr.msk.bf16.mxu1 %vm3522_vm5, %v3521_v45  ;;  %v2461_v46 = vsel %vm326_vm7, %v2450_v41, 0 }
 0x1c0   : > { %3144 = vmatmul.mubr.msk.bf16.vlgmr.msra.gmra.mxu0 %vm322_vm8, %v3142_v11  ;;  %3338 = vmatprep.subr.bf16.mxu1 %v3521_v45  ;;  %v2776_v63 = vpop.permute.xlu0 %2775 }
 0x1c1   : > { %2046 = vmatpush1.bf16.msra.mxu0 %v2023_v15  ;;  %2063 = vmatprep.mubr.bf16.mxu0 %v3520_v1  ;;  %v2550_v27 = vpop.permute.xlu1 %2549  ;;  %v3174_v15 = vld [vmem:[%s4186_s3 + $0x2e] sm:$0x3] }
 0x1c2   : > { %3151 = vmatprep.subr.msk.bf16.mxu0 %vm326_vm7, %v2125_v17  ;;  %v2558_v54 = vsel %vm2557_vm15, %v2550_v27, %v2552_v30 }
 0x1c3   : > { %v2565_v57 = vsel %vm326_vm7, %v2558_v54, 0 }
 0x1c4   : > { %v2882_v7 = vpop.permute.xlu0 %2881 }
 0x1c5   : > { %v2554_v33 = vpop.permute.xlu1 %2553 }
 0x1c6   : > { %3335 = vmatmul.mubr.msk.bf16.vlgmr.msra.gmra.mxu1 %vm322_vm8, %v3146_v18  ;;  %v2559_v49 = vsel %vm2557_vm15, %v2552_v30, %v2554_v33  ;;  %v2560_v51 = vsel %vm2557_vm15, %v2554_v33, %v2556_v37 }
 0x1c7   : > { %3339 = vmatpush3.bf16.msra.mxu1 %v2136_v21  ;;  %3340 = vmatprep.mubr.msk.bf16.mxu1 %vm3522_vm5, %v3521_v45  ;;  %v2571_v55 = vsel %vm326_vm7, %v2560_v51, 0 }
 0x1c8   : > { %3148 = vmatmul.mubr.msk.bf16.vlgmr.msra.gmra.mxu0 %vm322_vm8, %v3146_v18  ;;  %3344 = vmatprep.subr.bf16.mxu1 %v3521_v45  ;;  %v2886_v13 = vpop.permute.xlu0 %2885 }
 0x1c9   : > { %2153 = vmatpush1.bf16.msra.mxu0 %v2130_v23  ;;  %2170 = vmatprep.mubr.bf16.mxu0 %v3520_v1  ;;  %v2660_v39 = vpop.permute.xlu1 %2659 }
 0x1ca   : > { %3155 = vmatprep.subr.msk.bf16.mxu0 %vm326_vm7, %v2232_v24  ;;  %v2668_v62 = vsel %vm2667_vm0, %v2660_v39, %v2662_v43 }
 0x1cb   : > { %v2675_v2 = vsel %vm326_vm7, %v2668_v62, 0 }
 0x1cd   : > { %v2664_v47 = vpop.permute.xlu1 %2663 }
 0x1ce   : > { %3341 = vmatmul.mubr.msk.bf16.vlgmr.msra.gmra.mxu1 %vm322_vm8, %v3150_v26  ;;  %v2669_v58 = vsel %vm2667_vm0, %v2662_v43, %v2664_v47  ;;  %v2670_v60 = vsel %vm2667_vm0, %v2664_v47, %v2666_v50 }
 0x1cf   : > { %3345 = vmatpush3.bf16.msra.mxu1 %v2243_v29  ;;  %3346 = vmatprep.mubr.msk.bf16.mxu1 %vm3522_vm5, %v3521_v45  ;;  %v2681_v0 = vsel %vm326_vm7, %v2670_v60, 0 }
 0x1d0   : > { %3152 = vmatmul.mubr.msk.bf16.vlgmr.msra.gmra.mxu0 %vm322_vm8, %v3150_v26  ;;  %3350 = vmatprep.subr.bf16.mxu1 %v3521_v45 }
 0x1d1   : > { %2260 = vmatpush1.bf16.msra.mxu0 %v2237_v31  ;;  %2277 = vmatprep.mubr.bf16.mxu0 %v3520_v1  ;;  %v2770_v53 = vpop.permute.xlu1 %2769 }
 0x1d2   : > { %3159 = vmatprep.subr.msk.bf16.mxu0 %vm326_vm7, %v2339_v32  ;;  %v2778_v8 = vsel %vm2777_vm1, %v2770_v53, %v2772_v56 }
 0x1d3   : > { %v2785_v11 = vsel %vm326_vm7, %v2778_v8, 0 }
 0x1d5   : > { %v2774_v59 = vpop.permute.xlu1 %2773 }
 0x1d6   : > { %3347 = vmatmul.mubr.msk.bf16.vlgmr.msra.gmra.mxu1 %vm322_vm8, %v3154_v34  ;;  %v2779_v4 = vsel %vm2777_vm1, %v2772_v56, %v2774_v59  ;;  %v2780_v5 = vsel %vm2777_vm1, %v2774_v59, %v2776_v63 }
 0x1d7   : > { %3351 = vmatpush3.bf16.msra.mxu1 %v2350_v36  ;;  %3352 = vmatprep.mubr.msk.bf16.mxu1 %vm3522_vm5, %v3521_v45  ;;  %v2791_v9 = vsel %vm326_vm7, %v2780_v5, 0 }
 0x1d8   : > { %3156 = vmatmul.mubr.msk.bf16.vlgmr.msra.gmra.mxu0 %vm322_vm8, %v3154_v34  ;;  %3356 = vmatprep.subr.bf16.mxu1 %v3521_v45 }
 0x1d9   : > { %2367 = vmatpush1.bf16.msra.mxu0 %v2344_v38  ;;  %2384 = vmatprep.mubr.bf16.mxu0 %v3520_v1  ;;  %v2880_v3 = vpop.permute.xlu1 %2879 }
 0x1da   : > { %3163 = vmatprep.subr.msk.bf16.mxu0 %vm326_vm7, %v2449_v40  ;;  %v2888_v16 = vsel %vm2887_vm2, %v2880_v3, %v2882_v7 }
 0x1db   : > { %v2895_v18 = vsel %vm326_vm7, %v2888_v16, 0 }
 0x1dd   : > { %v2884_v10 = vpop.permute.xlu1 %2883 }
 0x1de   : > { %3353 = vmatmul.mubr.msk.bf16.vlgmr.msra.gmra.mxu1 %vm322_vm8, %v3158_v42  ;;  %v2889_v12 = vsel %vm2887_vm2, %v2882_v7, %v2884_v10  ;;  %v2890_v14 = vsel %vm2887_vm2, %v2884_v10, %v2886_v13 }
 0x1df   : > { %3357 = vmatpush3.bf16.msra.mxu1 %v2461_v46  ;;  %3358 = vmatprep.mubr.msk.bf16.mxu1 %vm3522_vm5, %v3521_v45  ;;  %v2901_v17 = vsel %vm326_vm7, %v2890_v14, 0 }
 0x1e0   : > { %3160 = vmatmul.mubr.msk.bf16.vlgmr.msra.gmra.mxu0 %vm322_vm8, %v3158_v42  ;;  %3362 = vmatprep.subr.bf16.mxu1 %v3521_v45 }
 0x1e1   : > { %2478 = vmatpush1.bf16.msra.mxu0 %v2455_v48  ;;  %2495 = vmatprep.mubr.bf16.mxu0 %v3520_v1 }
 0x1e2   : > { %3167 = vmatprep.subr.msk.bf16.mxu0 %vm326_vm7, %v2559_v49 }
 0x1e6   : > { %3359 = vmatmul.mubr.msk.bf16.vlgmr.msra.gmra.mxu1 %vm322_vm8, %v3162_v52 }
 0x1e7   : > { %3363 = vmatpush3.bf16.msra.mxu1 %v2571_v55  ;;  %3364 = vmatprep.mubr.msk.bf16.mxu1 %vm3522_vm5, %v3521_v45 }
 0x1e8   : > { %3164 = vmatmul.mubr.msk.bf16.vlgmr.msra.gmra.mxu0 %vm322_vm8, %v3162_v52  ;;  %3368 = vmatprep.subr.bf16.mxu1 %v3521_v45 }
 0x1e9   : > { %2588 = vmatpush1.bf16.msra.mxu0 %v2565_v57  ;;  %2605 = vmatprep.mubr.bf16.mxu0 %v3520_v1 }
 0x1ea   : > { %3171 = vmatprep.subr.msk.bf16.mxu0 %vm326_vm7, %v2669_v58 }
 0x1ee   : > { %3365 = vmatmul.mubr.msk.bf16.vlgmr.msra.gmra.mxu1 %vm322_vm8, %v3166_v61 }
 0x1ef   : > { %3369 = vmatpush3.bf16.msra.mxu1 %v2681_v0  ;;  %3370 = vmatprep.mubr.msk.bf16.mxu1 %vm3522_vm5, %v3521_v45 }
 0x1f0   : > { %3168 = vmatmul.mubr.msk.bf16.vlgmr.msra.gmra.mxu0 %vm322_vm8, %v3166_v61  ;;  %3374 = vmatprep.subr.bf16.mxu1 %v3521_v45 }
 0x1f1   : > { %2698 = vmatpush1.bf16.msra.mxu0 %v2675_v2  ;;  %2715 = vmatprep.mubr.bf16.mxu0 %v3520_v1 }
 0x1f2   : > { %3175 = vmatprep.subr.msk.bf16.mxu0 %vm326_vm7, %v2779_v4 }
 0x1f6   : > { %3371 = vmatmul.mubr.msk.bf16.vlgmr.msra.gmra.mxu1 %vm322_vm8, %v3170_v6 }
 0x1f7   : > { %3375 = vmatpush3.bf16.msra.mxu1 %v2791_v9  ;;  %3376 = vmatprep.mubr.msk.bf16.mxu1 %vm3522_vm5, %v3521_v45 }
 0x1f8   : > { %3172 = vmatmul.mubr.msk.bf16.vlgmr.msra.gmra.mxu0 %vm322_vm8, %v3170_v6  ;;  %3380 = vmatprep.subr.bf16.mxu1 %v3521_v45 }
 0x1f9   : > { %2808 = vmatpush1.bf16.msra.mxu0 %v2785_v11  ;;  %2825 = vmatprep.mubr.bf16.mxu0 %v3520_v1 }
 0x1fa   : > { %3179 = vmatprep.subr.msk.bf16.mxu0 %vm326_vm7, %v2889_v12 }
 0x1fe   : > { %3377 = vmatmul.mubr.msk.bf16.vlgmr.msra.gmra.mxu1 %vm322_vm8, %v3174_v15 }
 0x1ff   : > { %3381 = vmatpush3.bf16.msra.mxu1 %v2901_v17  ;;  %3382 = vmatprep.mubr.msk.bf16.mxu1 %vm3522_vm5, %v3521_v45  ;;  %vm3001_vm5 = vcmask 519168  }
 0x200   : > { %3176 = vmatmul.mubr.msk.bf16.vlgmr.msra.gmra.mxu0 %vm322_vm8, %v3174_v15 }
 0x201   : > { %2918 = vmatpush1.bf16.msra.mxu0 %v2895_v18  ;;  %2935 = vmatprep.mubr.bf16.mxu0 %v3520_v1 }
 0x206   : > { %v411_v20 = vpop.f32.mrf.mxu1  ;;  %3383 = vmatmul.mubr.msk.bf16.vlgmr.msra.gmra.mxu1 %vm322_vm8, %v3178_v19 }
 0x207   : > { %v370_v21 = vpop.f32.mrf.mxu0 }
 0x208   : > { %3180 = vmatmul.mubr.msk.bf16.vlgmr.msra.gmra.mxu0 %vm322_vm8, %v3178_v19  ;;  %v3240_v22 = vpop.f32.mrf.mxu1 }
 0x209   : > { %v372_v23 = vpop.f32.mrf.mxu0 }
 0x20a   : > { %v414_v45 = vpop.f32.mrf.mxu1 }
 0x20b   : > { %v374_v24 = vpop.f32.mrf.mxu0 }
 0x20c   : > { %v3241_v25 = vpop.f32.mrf.mxu1 }
 0x20d   : > { %v375_v26 = vpop.f32.mrf.mxu0 }
 0x20e   : > { %v504_v27 = vpop.f32.mrf.mxu1 }
 0x20f   : > { %v505_v28 = vadd.f32 %v504_v27, %v411_v20  ;;  %v463_v29 = vpop.f32.mrf.mxu0 }
 0x210   : > { %v464_v1 = vadd.f32 %v463_v29, %v370_v21  ;;  %v3246_v30 = vpop.f32.mrf.mxu1 }
 0x211   : > { %v465_v31 = vpop.f32.mrf.mxu0 }
 0x212   : > { %v466_v32 = vadd.f32 %v465_v31, %v372_v23  ;;  %v507_v33 = vpop.f32.mrf.mxu1 }
 0x213   : > { %v467_v34 = vpop.f32.mrf.mxu0 }
 0x214   : > { %v3247_v35 = vpop.f32.mrf.mxu1 }
 0x215   : > { %v468_v36 = vpop.f32.mrf.mxu0 }
 0x216   : > { %v608_v37 = vpop.f32.mrf.mxu1 }
 0x217   : > { %v616_v38 = vadd.f32 %v608_v37, %v505_v28 }
 0x218   : > { %v567_v39 = vpop.f32.mrf.mxu0  ;;  %v3252_v40 = vpop.f32.mrf.mxu1 }
 0x219   : > { %v614_v41 = vadd.f32 %v567_v39, %v464_v1 }
 0x21a   : > { %v569_v42 = vpop.f32.mrf.mxu0  ;;  %v611_v43 = vpop.f32.mrf.mxu1 }
 0x21b   : > { %v615_v44 = vadd.f32 %v569_v42, %v466_v32 }
 0x21c   : > { %v571_v46 = vpop.f32.mrf.mxu0  ;;  %v3253_v47 = vpop.f32.mrf.mxu1 }
 0x21e   : > { %v572_v48 = vpop.f32.mrf.mxu0  ;;  %v715_v49 = vpop.f32.mrf.mxu1 }
 0x21f   : > { %v723_v50 = vadd.f32 %v715_v49, %v616_v38 }
 0x220   : > { %v674_v51 = vpop.f32.mrf.mxu0  ;;  %v3258_v52 = vpop.f32.mrf.mxu1 }
 0x221   : > { %v721_v53 = vadd.f32 %v674_v51, %v614_v41 }
 0x222   : > { %v676_v54 = vpop.f32.mrf.mxu0  ;;  %v718_v55 = vpop.f32.mrf.mxu1 }
 0x223   : > { %v722_v56 = vadd.f32 %v676_v54, %v615_v44 }
 0x224   : > { %v678_v57 = vpop.f32.mrf.mxu0  ;;  %v3259_v58 = vpop.f32.mrf.mxu1 }
 0x226   : > { %v679_v59 = vpop.f32.mrf.mxu0  ;;  %v822_v60 = vpop.f32.mrf.mxu1 }
 0x227   : > { %v830_v61 = vadd.f32 %v822_v60, %v723_v50 }
 0x228   : > { %v781_v62 = vpop.f32.mrf.mxu0  ;;  %v3264_v63 = vpop.f32.mrf.mxu1 }
 0x229   : > { %v828_v0 = vadd.f32 %v781_v62, %v721_v53 }
 0x22a   : > { %v783_v2 = vpop.f32.mrf.mxu0  ;;  %v825_v3 = vpop.f32.mrf.mxu1 }
 0x22b   : > { %v829_v4 = vadd.f32 %v783_v2, %v722_v56 }
 0x22c   : > { %v785_v5 = vpop.f32.mrf.mxu0  ;;  %v3265_v6 = vpop.f32.mrf.mxu1 }
 0x22e   : > { %v786_v7 = vpop.f32.mrf.mxu0  ;;  %v929_v8 = vpop.f32.mrf.mxu1 }
 0x22f   : > { %v937_v9 = vadd.f32 %v929_v8, %v830_v61 }
 0x230   : > { %v888_v10 = vpop.f32.mrf.mxu0  ;;  %v3270_v11 = vpop.f32.mrf.mxu1 }
 0x231   : > { %v935_v12 = vadd.f32 %v888_v10, %v828_v0 }
 0x232   : > { %v890_v13 = vpop.f32.mrf.mxu0  ;;  %v932_v14 = vpop.f32.mrf.mxu1 }
 0x233   : > { %v936_v15 = vadd.f32 %v890_v13, %v829_v4 }
 0x234   : > { %v892_v16 = vpop.f32.mrf.mxu0  ;;  %v3271_v17 = vpop.f32.mrf.mxu1 }
 0x236   : > { %v893_v18 = vpop.f32.mrf.mxu0  ;;  %v1036_v19 = vpop.f32.mrf.mxu1 }
 0x237   : > { %v1044_v20 = vadd.f32 %v1036_v19, %v937_v9 }
 0x238   : > { %v995_v21 = vpop.f32.mrf.mxu0  ;;  %v3276_v22 = vpop.f32.mrf.mxu1 }
 0x239   : > { %v1042_v23 = vadd.f32 %v995_v21, %v935_v12 }
 0x23a   : > { %v997_v45 = vpop.f32.mrf.mxu0  ;;  %v1039_v24 = vpop.f32.mrf.mxu1 }
 0x23b   : > { %v1043_v25 = vadd.f32 %v997_v45, %v936_v15 }
 0x23c   : > { %v999_v26 = vpop.f32.mrf.mxu0  ;;  %v3277_v27 = vpop.f32.mrf.mxu1 }
 0x23e   : > { %v1000_v28 = vpop.f32.mrf.mxu0  ;;  %v1143_v29 = vpop.f32.mrf.mxu1 }
 0x23f   : > { %v1151_v1 = vadd.f32 %v1143_v29, %v1044_v20 }
 0x240   : > { %v1102_v30 = vpop.f32.mrf.mxu0  ;;  %v3282_v31 = vpop.f32.mrf.mxu1 }
 0x241   : > { %v1149_v32 = vadd.f32 %v1102_v30, %v1042_v23 }
 0x242   : > { %v1104_v33 = vpop.f32.mrf.mxu0  ;;  %v1146_v34 = vpop.f32.mrf.mxu1 }
 0x243   : > { %v1150_v35 = vadd.f32 %v1104_v33, %v1043_v25 }
 0x244   : > { %v1106_v36 = vpop.f32.mrf.mxu0  ;;  %v3283_v37 = vpop.f32.mrf.mxu1 }
 0x246   : > { %v1107_v38 = vpop.f32.mrf.mxu0  ;;  %v1250_v39 = vpop.f32.mrf.mxu1 }
 0x247   : > { %v1258_v40 = vadd.f32 %v1250_v39, %v1151_v1 }
 0x248   : > { %v1209_v41 = vpop.f32.mrf.mxu0  ;;  %v3288_v42 = vpop.f32.mrf.mxu1 }
 0x249   : > { %v1256_v43 = vadd.f32 %v1209_v41, %v1149_v32 }
 0x24a   : > { %v1211_v44 = vpop.f32.mrf.mxu0  ;;  %v1253_v46 = vpop.f32.mrf.mxu1 }
 0x24b   : > { %v1257_v47 = vadd.f32 %v1211_v44, %v1150_v35 }
 0x24c   : > { %v1213_v48 = vpop.f32.mrf.mxu0  ;;  %v3289_v49 = vpop.f32.mrf.mxu1 }
 0x24e   : > { %v1214_v50 = vpop.f32.mrf.mxu0  ;;  %v1357_v51 = vpop.f32.mrf.mxu1 }
 0x24f   : > { %v1365_v52 = vadd.f32 %v1357_v51, %v1258_v40 }
 0x250   : > { %v1316_v53 = vpop.f32.mrf.mxu0  ;;  %v3294_v54 = vpop.f32.mrf.mxu1 }
 0x251   : > { %v1363_v55 = vadd.f32 %v1316_v53, %v1256_v43 }
 0x252   : > { %v1318_v56 = vpop.f32.mrf.mxu0  ;;  %v1360_v57 = vpop.f32.mrf.mxu1 }
 0x253   : > { %v1364_v58 = vadd.f32 %v1318_v56, %v1257_v47 }
 0x254   : > { %v1320_v59 = vpop.f32.mrf.mxu0  ;;  %v3295_v60 = vpop.f32.mrf.mxu1 }
 0x256   : > { %v1321_v61 = vpop.f32.mrf.mxu0  ;;  %v1464_v62 = vpop.f32.mrf.mxu1 }
 0x257   : > { %v1472_v63 = vadd.f32 %v1464_v62, %v1365_v52 }
 0x258   : > { %v1423_v0 = vpop.f32.mrf.mxu0  ;;  %v3300_v2 = vpop.f32.mrf.mxu1 }
 0x259   : > { %v1470_v3 = vadd.f32 %v1423_v0, %v1363_v55 }
 0x25a   : > { %v1425_v4 = vpop.f32.mrf.mxu0  ;;  %v1467_v5 = vpop.f32.mrf.mxu1 }
 0x25b   : > { %v1471_v6 = vadd.f32 %v1425_v4, %v1364_v58 }
 0x25c   : > { %v1427_v7 = vpop.f32.mrf.mxu0  ;;  %v3301_v8 = vpop.f32.mrf.mxu1 }
 0x25e   : > { %v1428_v9 = vpop.f32.mrf.mxu0  ;;  %v1571_v10 = vpop.f32.mrf.mxu1 }
 0x25f   : > { %v1579_v11 = vadd.f32 %v1571_v10, %v1472_v63 }
 0x260   : > { %v1530_v12 = vpop.f32.mrf.mxu0  ;;  %v3306_v13 = vpop.f32.mrf.mxu1 }
 0x261   : > { %v1577_v14 = vadd.f32 %v1530_v12, %v1470_v3 }
 0x262   : > { %v1532_v15 = vpop.f32.mrf.mxu0  ;;  %v1574_v16 = vpop.f32.mrf.mxu1 }
 0x263   : > { %v1578_v17 = vadd.f32 %v1532_v15, %v1471_v6 }
 0x264   : > { %v1534_v18 = vpop.f32.mrf.mxu0  ;;  %v3307_v19 = vpop.f32.mrf.mxu1 }
 0x266   : > { %v1535_v20 = vpop.f32.mrf.mxu0  ;;  %v1678_v21 = vpop.f32.mrf.mxu1 }
 0x267   : > { %v1686_v22 = vadd.f32 %v1678_v21, %v1579_v11 }
 0x268   : > { %v1637_v23 = vpop.f32.mrf.mxu0  ;;  %v3312_v45 = vpop.f32.mrf.mxu1 }
 0x269   : > { %v1684_v24 = vadd.f32 %v1637_v23, %v1577_v14 }
 0x26a   : > { %v1639_v25 = vpop.f32.mrf.mxu0  ;;  %v1681_v26 = vpop.f32.mrf.mxu1 }
 0x26b   : > { %v1685_v27 = vadd.f32 %v1639_v25, %v1578_v17 }
 0x26c   : > { %v1641_v28 = vpop.f32.mrf.mxu0  ;;  %v3313_v29 = vpop.f32.mrf.mxu1 }
 0x26e   : > { %v1642_v1 = vpop.f32.mrf.mxu0  ;;  %v1785_v30 = vpop.f32.mrf.mxu1 }
 0x26f   : > { %v4130_v31 = vadd.f32 %v1785_v30, %v1686_v22 }
 0x270   : > { %v1744_v32 = vpop.f32.mrf.mxu0  ;;  %v3318_v33 = vpop.f32.mrf.mxu1 }
 0x271   : > { %v4132_v34 = vadd.f32 %v1744_v32, %v1684_v24 }
 0x272   : > { %v1746_v35 = vpop.f32.mrf.mxu0  ;;  %v1788_v36 = vpop.f32.mrf.mxu1 }
 0x273   : > { %v4134_v37 = vadd.f32 %v1746_v35, %v1685_v27 }
 0x274   : > { %v1748_v38 = vpop.f32.mrf.mxu0  ;;  %v3319_v39 = vpop.f32.mrf.mxu1 }
 0x276   : > { %v1749_v40 = vpop.f32.mrf.mxu0  ;;  %v1892_v41 = vpop.f32.mrf.mxu1 }
 0x278   : > { %v4136_v42 = vpop.f32.mrf.mxu0  ;;  %v3324_v43 = vpop.f32.mrf.mxu1 }
 0x279   : > { %v1900_v43 = vadd.f32 %v1892_v41, %v4130_v31 }
 0x27a   : > { %v4138_v44 = vpop.f32.mrf.mxu0  ;;  %v1895_v46 = vpop.f32.mrf.mxu1 }
 0x27c   : > { %v1855_v47 = vpop.f32.mrf.mxu0  ;;  %v3325_v48 = vpop.f32.mrf.mxu1 }
 0x27d   : > { %v1898_v48 = vadd.f32 %v4136_v42, %v4132_v34 }
 0x27e   : > { %v1856_v49 = vpop.f32.mrf.mxu0  ;;  %v1999_v50 = vpop.f32.mrf.mxu1 }
 0x27f   : > { %v2007_v49 = vadd.f32 %v1999_v50, %v1900_v43 }
 0x280   : > { %v1958_v51 = vpop.f32.mrf.mxu0  ;;  %v3330_v52 = vpop.f32.mrf.mxu1 }
 0x282   : > { %v1960_v53 = vpop.f32.mrf.mxu0  ;;  %v2002_v54 = vpop.f32.mrf.mxu1 }
 0x284   : > { %v1962_v55 = vpop.f32.mrf.mxu0  ;;  %v3331_v56 = vpop.f32.mrf.mxu1 }
 0x285   : > { %v1899_v55 = vadd.f32 %v4138_v44, %v4134_v37  ;;  %v2005_v56 = vadd.f32 %v1958_v51, %v1898_v48 }
 0x286   : > { %v1963_v57 = vpop.f32.mrf.mxu0  ;;  %v2106_v58 = vpop.f32.mrf.mxu1 }
 0x287   : > { %v2114_v57 = vadd.f32 %v2106_v58, %v2007_v49 }
 0x288   : > { %v2065_v59 = vpop.f32.mrf.mxu0  ;;  %v3336_v60 = vpop.f32.mrf.mxu1 }
 0x28a   : > { %v2067_v61 = vpop.f32.mrf.mxu0  ;;  %v2109_v62 = vpop.f32.mrf.mxu1 }
 0x28c   : > { %v2069_v63 = vpop.f32.mrf.mxu0  ;;  %v3337_v0 = vpop.f32.mrf.mxu1 }
 0x28d   : > { %v2006_v63 = vadd.f32 %v1960_v53, %v1899_v55  ;;  %v2112_v0 = vadd.f32 %v2065_v59, %v2005_v56 }
 0x28e   : > { %v2070_v2 = vpop.f32.mrf.mxu0  ;;  %v2213_v3 = vpop.f32.mrf.mxu1 }
 0x28f   : > { %v2221_v2 = vadd.f32 %v2213_v3, %v2114_v57  ;;  %v2113_v41 = vadd.f32 %v2067_v61, %v2006_v63 }
 0x290   : > { %v2172_v4 = vpop.f32.mrf.mxu0  ;;  %v3342_v5 = vpop.f32.mrf.mxu1 }
 0x292   : > { %v2174_v6 = vpop.f32.mrf.mxu0  ;;  %v2216_v7 = vpop.f32.mrf.mxu1 }
 0x293   : > { %v2219_v7 = vadd.f32 %v2172_v4, %v2112_v0  ;;  %v2220_v50 = vadd.f32 %v2174_v6, %v2113_v41 }
 0x294   : > { %v2176_v8 = vpop.f32.mrf.mxu0  ;;  %v3343_v9 = vpop.f32.mrf.mxu1 }
 0x296   : > { %v2177_v10 = vpop.f32.mrf.mxu0  ;;  %v2320_v11 = vpop.f32.mrf.mxu1 }
 0x297   : > { %v2328_v8 = vadd.f32 %v2320_v11, %v2221_v2 }
 0x298   : > { %v2279_v12 = vpop.f32.mrf.mxu0  ;;  %v3348_v13 = vpop.f32.mrf.mxu1 }
 0x299   : > { %v2326_v9 = vadd.f32 %v2279_v12, %v2219_v7 }
 0x29a   : > { %v2281_v14 = vpop.f32.mrf.mxu0  ;;  %v2323_v15 = vpop.f32.mrf.mxu1 }
 0x29b   : > { %v2327_v44 = vadd.f32 %v2281_v14, %v2220_v50 }
 0x29c   : > { %v2283_v16 = vpop.f32.mrf.mxu0  ;;  %v3349_v17 = vpop.f32.mrf.mxu1 }
 0x29e   : > { %v2284_v18 = vpop.f32.mrf.mxu0  ;;  %v2427_v19 = vpop.f32.mrf.mxu1 }
 0x29f   : > { %v2435_v10 = vadd.f32 %v2427_v19, %v2328_v8 }
 0x2a0   : > { %v2386_v20 = vpop.f32.mrf.mxu0  ;;  %v3354_v21 = vpop.f32.mrf.mxu1 }
 0x2a1   : > { %v2433_v51 = vadd.f32 %v2386_v20, %v2326_v9 }
 0x2a2   : > { %v2388_v22 = vpop.f32.mrf.mxu0  ;;  %v2430_v23 = vpop.f32.mrf.mxu1 }
 0x2a3   : > { %v2434_v3 = vadd.f32 %v2388_v22, %v2327_v44 }
 0x2a4   : > { %v2390_v45 = vpop.f32.mrf.mxu0  ;;  %v3355_v24 = vpop.f32.mrf.mxu1 }
 0x2a5   : > { %v2991_v45 = vpop.permute.xlu1 %2990 }
 0x2a6   : > { %v2391_v25 = vpop.f32.mrf.mxu0  ;;  %v2538_v26 = vpop.f32.mrf.mxu1 }
 0x2a7   : > { %v2546_v58 = vadd.f32 %v2538_v26, %v2435_v10 }
 0x2a8   : > { %v2497_v27 = vpop.f32.mrf.mxu0  ;;  %v3360_v28 = vpop.f32.mrf.mxu1 }
 0x2a9   : > { %v2544_v15 = vadd.f32 %v2497_v27, %v2433_v51 }
 0x2aa   : > { %v2499_v29 = vpop.f32.mrf.mxu0  ;;  %v2541_v1 = vpop.f32.mrf.mxu1 }
 0x2ab   : > { %v2545_v11 = vadd.f32 %v2499_v29, %v2434_v3 }
 0x2ac   : > { %v2501_v30 = vpop.f32.mrf.mxu0  ;;  %v3361_v32 = vpop.f32.mrf.mxu1 }
 0x2ae   : > { %v2502_v33 = vpop.f32.mrf.mxu0  ;;  %v2648_v35 = vpop.f32.mrf.mxu1 }
 0x2af   : > { %v2656_v16 = vadd.f32 %v2648_v35, %v2546_v58 }
 0x2b0   : > { %v2607_v36 = vpop.f32.mrf.mxu0  ;;  %v3366_v38 = vpop.f32.mrf.mxu1 }
 0x2b1   : > { %v2654_v17 = vadd.f32 %v2607_v36, %v2544_v15 }
 0x2b2   : > { %v2609_v39 = vpop.f32.mrf.mxu0  ;;  %v2651_v40 = vpop.f32.mrf.mxu1 }
 0x2b3   : > { %v2655_v19 = vadd.f32 %v2609_v39, %v2545_v11 }
 0x2b4   : > { %v2611_v46 = vpop.f32.mrf.mxu0  ;;  %v3367_v47 = vpop.f32.mrf.mxu1 }
 0x2b6   : > { %v2612_v52 = vpop.f32.mrf.mxu0  ;;  %v2758_v54 = vpop.f32.mrf.mxu1 }
 0x2b7   : > { %v2766_v18 = vadd.f32 %v2758_v54, %v2656_v16 }
 0x2b8   : > { %v2717_v60 = vpop.f32.mrf.mxu0  ;;  %v3372_v62 = vpop.f32.mrf.mxu1 }
 0x2b9   : > { %v2764_v14 = vadd.f32 %v2717_v60, %v2654_v17 }
 0x2ba   : > { %v2719_v5 = vpop.f32.mrf.mxu0  ;;  %v2761_v31 = vpop.f32.mrf.mxu1 }
 0x2bb   : > { %v2765_v22 = vadd.f32 %v2719_v5, %v2655_v19 }
 0x2bc   : > { %v2721_v34 = vpop.f32.mrf.mxu0  ;;  %v3373_v42 = vpop.f32.mrf.mxu1 }
 0x2be   : > { %v2722_v13 = vpop.f32.mrf.mxu0  ;;  %v2868_v37 = vpop.f32.mrf.mxu1 }
 0x2bf   : > { %v2876_v21 = vadd.f32 %v2868_v37, %v2766_v18 }
 0x2c0   : > { %v2827_v53 = vpop.f32.mrf.mxu0  ;;  %v3378_v59 = vpop.f32.mrf.mxu1 }
 0x2c1   : > { %v2874_v24 = vadd.f32 %v2827_v53, %v2764_v14 }
 0x2c2   : > { %v2829_v61 = vpop.f32.mrf.mxu0  ;;  %v2871_v4 = vpop.f32.mrf.mxu1 }
 0x2c3   : > { %v2875_v28 = vadd.f32 %v2829_v61, %v2765_v22 }
 0x2c4   : > { %v2831_v6 = vpop.f32.mrf.mxu0  ;;  %v3379_v12 = vpop.f32.mrf.mxu1 }
 0x2c6   : > { %v2832_v20 = vpop.f32.mrf.mxu0  ;;  %v2978_v23 = vpop.f32.mrf.mxu1 }
 0x2c7   : > { %v2986_v25 = vadd.f32 %v2978_v23, %v2876_v21 }
 0x2c8   : > { %v2937_v26 = vpop.f32.mrf.mxu0  ;;  %v3384_v27 = vpop.f32.mrf.mxu1 }
 0x2c9   : > { %v2995_v29 = vadd.f32 %v2991_v45, %v2986_v25  ;;  %v2984_v1 = vadd.f32 %v2937_v26, %v2874_v24 }
 0x2ca   : > { %v2939_v30 = vpop.f32.mrf.mxu0  ;;  %v2981_v32 = vpop.f32.mrf.mxu1 }
 0x2cb   : > { %v2985_v33 = vadd.f32 %v2939_v30, %v2875_v28  ;;  %3002 = vst.msk [vmem:[%s217_s12 + $0x8] sm:$0xf] %vm3001_vm5, %v2995_v29  ;;  %v2993_v38 = vadd.f32 %v2991_v45, %v2984_v1 }
 0x2cc   : > { %v2941_v35 = vpop.f32.mrf.mxu0  ;;  %v3385_v36 = vpop.f32.mrf.mxu1 }
 0x2cd   : > { %v2994_v39 = vadd.f32 %v2991_v45, %v2985_v33 }
 0x2ce   : > { %v2942_v40 = vpop.f32.mrf.mxu0 }
 0x2cf   : > { %v2998_v43 = vcombine.low %v2993_v38, %v2994_v39 }
 0x2d1   : > { %3000 = vst [vmem:[%s217_s12] sm:$0xff] %v2998_v43 }
 0x2d2   : > { %3471 = shalt.err (!%p3468_p3)
}
 0x2d3   : > { %s3472_s6 = scalar_lea.hbm %s3016_s17, 192  ;;  %s3476_s9 = scalar_lea.hbm %s4188_s5, 384 }
 0x2d4   : > { %p3473_p4 = scmp.ne.s32.totalorder %s3016_s17, %s3472_s6  ;;  %p3477_p9 = scmp.lt.s32.totalorder %s3016_s17, %s4188_s5 }
 0x2d5   : > { %p3478_p10 = scmp.lt.s32.totalorder %s3476_s9, %s3472_s6 }
 0x2d6   : > { %p3474_p7 = pnand %p3473_p4, %p3616_p5 }
 0x2d7   : > { %p3479_p11 = por %p3478_p10, %p3477_p9 }
 0x2d8   : > { %p3475_p8 = pneg %p3474_p7 }
 0x2da   : > { %p3480_p12 = pnand %p3479_p11, %p3475_p8 }
 0x2dc   : > { %3483 = shalt.err (!%p3480_p12)
}
 0x2dd   : > { %3388 = dma.vmem_to_hbm [thread:$0]  (%p3616_p5), %s3019_s14, 192, %s3016_s17, %s3004_s23  }
 0x2de PF: > { %p3394_p13 = scmp.ge.s32.totalorder %s3518_s21, 2  ;;  %s3030_s12 = sand.u32 1, %s3506_s18  }
 0x2df   : > { %s3031_s13 = scalar_lea.sflag [#allocation3], %s3030_s12 }
 0x2e0   : > { %p3391_p0 = pnand %p3394_p13, %p3620_p6 }
 0x2e2   : > { %p3392_p1 = pneg %p3391_p0 }
 0x2e4   : > { %3501 = dma.done.wait (%p3392_p1), %s3031_s13, 192  }
 0x2e5   : > { %3503 = vsyncadd (%p3392_p1), %s3031_s13, 4294967104  ;;  %p15_p2 = scmp.ge.s32.totalorder %s3603_s24, 4   ;;  %s4191_s18 = smov %s3510_s19 }
 0x2e6   : > { %s4192_s19 = smov %s3514_s20  ;;  %s4193_s20 = smov %s3614_s27 }
 0x2e7   : > { %s4194_s21 = smov %s3603_s24  ;;  %17 = sbr.rel (!%p15_p2) target bundleno = 3 (0x3), region = 99 }
 0x2ec   :  { %3036 = vsyncpa [#allocation3], 1 }
 0x2ed   :  { %3038 = vsyncpa [#allocation3 + $0x1], 1 }

</bundles_post_ra>
